<compile_context>
chip_gen: v6e
topology: v6e:2x2x1
jax: 0.10.0
libtpu: 0.0.40
codegen_flags: <defaults>
</compile_context>

<pallas_src>
import functools
import math

import jax
import jax.numpy as jnp
from jax import lax
from jax.experimental import pallas as pl
from jax.experimental.pallas import tpu as pltpu

EPS = 1e-5                       # PyTorch nn.LayerNorm default
COMPUTE_DTYPE = jnp.bfloat16     # MXU input dtype (accumulation is f32)


def _layernorm(x, gamma, beta):
    x = x.astype(jnp.float32)
    mu = jnp.mean(x, axis=-1, keepdims=True)
    var = jnp.mean((x - mu) ** 2, axis=-1, keepdims=True)
    return (x - mu) * lax.rsqrt(var + EPS) * gamma + beta


# ---------------------------------------------------------------------------
# Fused kernel: one program per batch element.
# ---------------------------------------------------------------------------
def _layer_kernel(x_ref,
                  attn_g_ref, attn_b_ref,
                  wqkv_ref, bqkv_ref,        # (E, 3E) bf16 / (1, 3E) f32
                  wo_ref, bo_ref,            # (E, E)  bf16 / (1, E)  f32
                  fin_g_ref, fin_b_ref,
                  w1_ref, b1_ref,            # (E, F)  bf16 / (1, F)  f32
                  w2_ref, b2_ref,            # (F, E)  bf16 / (1, E)  f32
                  out_ref,
                  *, n_head, do_layer_norm_before):
    f32 = jnp.float32
    x = x_ref[0].astype(f32)                  # (S, E)
    S, E = x.shape
    H = n_head
    dh = E // H

    # ---------------- attention block ----------------
    residual = x
    xn = _layernorm(x, attn_g_ref[...], attn_b_ref[...]) if do_layer_norm_before else x

    # Fused QKV projection: single lane-dense (S,E)@(E,3E) matmul (N=3E).
    # 1/sqrt(dh) is already folded into the q columns of wqkv/bqkv.
    qkv = jnp.dot(xn.astype(COMPUTE_DTYPE), wqkv_ref[...],
                  preferred_element_type=f32) + bqkv_ref[...]          # (S, 3E) f32
    qkv_c = qkv.astype(COMPUTE_DTYPE)

    # Per-head attention with static lane slices; only one (S,S) score matrix
    # is live at a time.  (QK^T / PV contractions are inherently dh-wide per
    # head — batching over heads would not change MXU fill.)
    ctx_parts = []
    for h in range(H):
        q_h = qkv_c[:, h * dh:(h + 1) * dh]                            # (S, dh)
        k_h = qkv_c[:, E + h * dh:E + (h + 1) * dh]
        v_h = qkv_c[:, 2 * E + h * dh:2 * E + (h + 1) * dh]
        s_h = lax.dot_general(q_h, k_h,
                              dimension_numbers=(((1,), (1,)), ((), ())),
                              preferred_element_type=f32)              # (S, S)
        s_h = s_h - jnp.max(s_h, axis=-1, keepdims=True)
        p_h = jnp.exp(s_h)
        p_h = p_h * pl.reciprocal(jnp.sum(p_h, axis=-1, keepdims=True), approx=True)
        ctx_parts.append(jnp.dot(p_h.astype(COMPUTE_DTYPE), v_h,
                                 preferred_element_type=f32))          # (S, dh)

    # Assemble per-head contexts along lanes -> (S, H*dh) so the output
    # projection is a single matmul with the head reduction in the MXU K dim.
    ctx = jnp.concatenate(ctx_parts, axis=-1)                          # (S, E)
    attn_out = jnp.dot(ctx.astype(COMPUTE_DTYPE), wo_ref[...],
                       preferred_element_type=f32) + bo_ref[...]       # (S, E)

    h1 = residual + attn_out
    if not do_layer_norm_before:
        h1 = _layernorm(h1, attn_g_ref[...], attn_b_ref[...])

    # ---------------- FFN block (per-row, same as torch reshape(-1, E)) -----
    residual2 = h1
    hn = _layernorm(h1, fin_g_ref[...], fin_b_ref[...]) if do_layer_norm_before else h1
    a = jnp.dot(hn.astype(COMPUTE_DTYPE), w1_ref[...],
                preferred_element_type=f32) + b1_ref[...]
    a = jnp.maximum(a, 0.0)                                            # ReLU
    y = jnp.dot(a.astype(COMPUTE_DTYPE), w2_ref[...],
                preferred_element_type=f32) + b2_ref[...]
    out = residual2 + y
    if not do_layer_norm_before:
        out = _layernorm(out, fin_g_ref[...], fin_b_ref[...])
    out_ref[0] = out.astype(out_ref.dtype)


# ---------------------------------------------------------------------------
# Wrapper-side parameter preparation (done once, outside the kernel):
#   * PyTorch (out,in) weights -> (in,out), fused QKV layout (E, 3E), bf16
#   * 1/sqrt(dh) folded into the q weights + bias
# ---------------------------------------------------------------------------
def prepare_params(params, n_head):
    E = params["wq"].shape[0]
    dh = E // n_head
    scale = 1.0 / math.sqrt(dh)
    r2 = lambda v: v.reshape(1, -1).astype(jnp.float32)

    wqkv = jnp.concatenate([params["wq"].T * scale,
                            params["wk"].T,
                            params["wv"].T], axis=1)                   # (E, 3E)
    bqkv = jnp.concatenate([params["bq"] * scale,
                            params["bk"],
                            params["bv"]]).reshape(1, -1)              # (1, 3E)
    return dict(
        attn_ln_g=r2(params["attn_ln_g"]), attn_ln_b=r2(params["attn_ln_b"]),
        wqkv=wqkv.astype(COMPUTE_DTYPE), bqkv=bqkv.astype(jnp.float32),
        wo2d=params["wo"].T.astype(COMPUTE_DTYPE),                     # (E, E)
        bo=r2(params["bo"]),
        final_ln_g=r2(params["final_ln_g"]), final_ln_b=r2(params["final_ln_b"]),
        w1t=params["fc1_w"].T.astype(COMPUTE_DTYPE), b1=r2(params["fc1_b"]),
        w2t=params["fc2_w"].T.astype(COMPUTE_DTYPE), b2=r2(params["fc2_b"]),
    )


def transformer_layer_pallas(x, prep, *, n_head, do_layer_norm_before):
    B, S, E = x.shape
    kernel = functools.partial(_layer_kernel, n_head=n_head,
                               do_layer_norm_before=do_layer_norm_before)
    weights = (prep["attn_ln_g"], prep["attn_ln_b"],
               prep["wqkv"], prep["bqkv"], prep["wo2d"], prep["bo"],
               prep["final_ln_g"], prep["final_ln_b"],
               prep["w1t"], prep["b1"], prep["w2t"], prep["b2"])

    # VMEM budget from actual buffer sizes, clamped to 48 MiB so the same
    # tiling is safe on v7x (64 MiB VMEM); v5e/v6e have 128 MiB of headroom.
    weight_bytes = sum(int(w.size) * w.dtype.itemsize for w in weights)
    act_bytes = 2 * (2 * S * E * x.dtype.itemsize)        # in+out, double-buffered
    vmem_bytes = int(min(max(4 * (weight_bytes + act_bytes) + (4 << 20), 16 << 20),
                         48 << 20))

    act_spec = pl.BlockSpec((1, S, E), lambda b: (b, 0, 0))

    def build(single_buffer_weights):
        def wspec(a):
            zeros = (0,) * a.ndim
            if single_buffer_weights:
                # Loop-invariant weights: a single VMEM buffer is enough.
                return pl.BlockSpec(a.shape, lambda b, _z=zeros: _z,
                                    pipeline_mode=pl.Buffered(1))
            return pl.BlockSpec(a.shape, lambda b, _z=zeros: _z)

        return pl.pallas_call(
            kernel,
            out_shape=jax.ShapeDtypeStruct((B, S, E), x.dtype),
            grid=(B,),
            in_specs=[act_spec] + [wspec(w) for w in weights],
            out_specs=act_spec,
            compiler_params=pltpu.CompilerParams(
                dimension_semantics=("parallel",),
                vmem_limit_bytes=vmem_bytes),
        )

    try:
        return jax.block_until_ready(build(True)(x, *weights))
    except Exception:
        # Fallback if Buffered(1) is not accepted by this JAX/Mosaic version.
        return jax.block_until_ready(build(False)(x, *weights))


# ---------------------------------------------------------------------------
# Pure-JAX reference (same mixed-precision math, no Pallas)
# ---------------------------------------------------------------------------
def reference(x, prep, *, n_head, do_layer_norm_before):
    f32 = jnp.float32
    B, S, E = x.shape
    H = n_head
    dh = E // H

    residual = x.astype(f32)
    hs = (_layernorm(x, prep["attn_ln_g"], prep["attn_ln_b"])
          if do_layer_norm_before else x.astype(f32))
    qkv = jnp.einsum("bse,ef->bsf", hs.astype(COMPUTE_DTYPE), prep["wqkv"],
                     preferred_element_type=f32) + prep["bqkv"]
    qkv_c = qkv.astype(COMPUTE_DTYPE)
    q = qkv_c[..., :E].reshape(B, S, H, dh)
    k = qkv_c[..., E:2 * E].reshape(B, S, H, dh)
    v = qkv_c[..., 2 * E:].reshape(B, S, H, dh)
    s = jnp.einsum("bqhd,bkhd->bhqk", q, k, preferred_element_type=f32)
    p = jax.nn.softmax(s, axis=-1)
    ctx = jnp.einsum("bhqk,bkhd->bqhd", p.astype(COMPUTE_DTYPE), v,
                     preferred_element_type=f32).reshape(B, S, E)
    attn = jnp.dot(ctx.astype(COMPUTE_DTYPE), prep["wo2d"],
                   preferred_element_type=f32) + prep["bo"]
    hs = residual + attn
    if not do_layer_norm_before:
        hs = _layernorm(hs, prep["attn_ln_g"], prep["attn_ln_b"])

    residual2 = hs
    h2 = (_layernorm(hs, prep["final_ln_g"], prep["final_ln_b"])
          if do_layer_norm_before else hs)
    h2 = jnp.maximum(jnp.dot(h2.astype(COMPUTE_DTYPE), prep["w1t"],
                             preferred_element_type=f32) + prep["b1"], 0.0)
    h2 = jnp.dot(h2.astype(COMPUTE_DTYPE), prep["w2t"],
                 preferred_element_type=f32) + prep["b2"]
    out = residual2 + h2
    if not do_layer_norm_before:
        out = _layernorm(out, prep["final_ln_g"], prep["final_ln_b"])
    return out.astype(x.dtype)


if __name__ == "__main__":
    # embed_dim=32, ffn_dim=128, bias=True, n_head=4, is_h2o=False
    # input (batch=2, seq=8, embed=32)
    B, S, E, H, F = 2, 8, 32, 4, 128
    key = jax.random.PRNGKey(0)
    ks = jax.random.split(key, 13)
    nrm = lambda k, shape, sc=0.05: jax.random.normal(k, shape, jnp.float32) * sc

    raw = dict(
        attn_ln_g=jnp.ones((E,), jnp.float32),
        attn_ln_b=jnp.zeros((E,), jnp.float32),
        wq=nrm(ks[0], (E, E)), bq=nrm(ks[1], (E,)),
        wk=nrm(ks[2], (E, E)), bk=nrm(ks[3], (E,)),
        wv=nrm(ks[4], (E, E)), bv=nrm(ks[5], (E,)),
        wo=nrm(ks[6], (E, E)), bo=nrm(ks[7], (E,)),
        final_ln_g=jnp.ones((E,), jnp.float32),
        final_ln_b=jnp.zeros((E,), jnp.float32),
        fc1_w=nrm(ks[8], (F, E)), fc1_b=nrm(ks[9], (F,)),
        fc2_w=nrm(ks[10], (E, F)), fc2_b=nrm(ks[11], (E,)),
    )
    x = nrm(ks[12], (B, S, E), sc=1.0)

    prep = prepare_params(raw, n_head=H)

    for before in (True, False):
        out = transformer_layer_pallas(x, prep, n_head=H, do_layer_norm_before=before)
        out = jax.block_until_ready(out)
        ref = reference(x, prep, n_head=H, do_layer_norm_before=before)
        assert out.shape == (B, S, E) and out.dtype == x.dtype
        err = float(jnp.max(jnp.abs(out - ref)))
        assert jnp.allclose(out, ref, rtol=5e-3, atol=5e-3), \
            f"mismatch vs reference (do_layer_norm_before={before}, max_abs_err={err})"

    print("KERNEL_OK")
</pallas_src>

<mosaic_0001>
module attributes {stable_mosaic.version = 11 : i64} {
  func.func @_layer_kernel(%arg0: i32, %arg1: memref<1x8x32xf32, #tpu.memory_space<vmem>>, %arg2: memref<1x32xf32, #tpu.memory_space<vmem>>, %arg3: memref<1x32xf32, #tpu.memory_space<vmem>>, %arg4: memref<32x96xbf16, #tpu.memory_space<vmem>>, %arg5: memref<1x96xf32, #tpu.memory_space<vmem>>, %arg6: memref<32x32xbf16, #tpu.memory_space<vmem>>, %arg7: memref<1x32xf32, #tpu.memory_space<vmem>>, %arg8: memref<1x32xf32, #tpu.memory_space<vmem>>, %arg9: memref<1x32xf32, #tpu.memory_space<vmem>>, %arg10: memref<32x128xbf16, #tpu.memory_space<vmem>>, %arg11: memref<1x128xf32, #tpu.memory_space<vmem>>, %arg12: memref<128x32xbf16, #tpu.memory_space<vmem>>, %arg13: memref<1x32xf32, #tpu.memory_space<vmem>>, %arg14: memref<1x8x32xf32, #tpu.memory_space<vmem>>) attributes {dimension_semantics = [#tpu.dimension_semantics<parallel>], iteration_bounds = array<i64: 2>, scalar_prefetch = 0 : i64, scratch_operands = 0 : i64, tpu.core_type = #tpu.core_type<tc>, window_params = [{transform_indices = @transform_0, window_bounds = array<i64: 1, 8, 32>}, {pipeline_mode = #tpu.pipeline_mode<synchronous>, transform_indices = @transform_1, window_bounds = array<i64: 1, 32>}, {pipeline_mode = #tpu.pipeline_mode<synchronous>, transform_indices = @transform_2, window_bounds = array<i64: 1, 32>}, {pipeline_mode = #tpu.pipeline_mode<synchronous>, transform_indices = @transform_3, window_bounds = array<i64: 32, 96>}, {pipeline_mode = #tpu.pipeline_mode<synchronous>, transform_indices = @transform_4, window_bounds = array<i64: 1, 96>}, {pipeline_mode = #tpu.pipeline_mode<synchronous>, transform_indices = @transform_5, window_bounds = array<i64: 32, 32>}, {pipeline_mode = #tpu.pipeline_mode<synchronous>, transform_indices = @transform_6, window_bounds = array<i64: 1, 32>}, {pipeline_mode = #tpu.pipeline_mode<synchronous>, transform_indices = @transform_7, window_bounds = array<i64: 1, 32>}, {pipeline_mode = #tpu.pipeline_mode<synchronous>, transform_indices = @transform_8, window_bounds = array<i64: 1, 32>}, {pipeline_mode = #tpu.pipeline_mode<synchronous>, transform_indices = @transform_9, window_bounds = array<i64: 32, 128>}, {pipeline_mode = #tpu.pipeline_mode<synchronous>, transform_indices = @transform_10, window_bounds = array<i64: 1, 128>}, {pipeline_mode = #tpu.pipeline_mode<synchronous>, transform_indices = @transform_11, window_bounds = array<i64: 128, 32>}, {pipeline_mode = #tpu.pipeline_mode<synchronous>, transform_indices = @transform_12, window_bounds = array<i64: 1, 32>}, {transform_indices = @transform_13, window_bounds = array<i64: 1, 8, 32>}]} {
    %c0 = arith.constant 0 : index
    %c0_0 = arith.constant 0 : index
    %c0_1 = arith.constant 0 : index
    %0 = vector.load %arg1[%c0, %c0_0, %c0_1] : memref<1x8x32xf32, #tpu.memory_space<vmem>>, vector<1x8x32xf32>
    %1 = vector.shape_cast %0 : vector<1x8x32xf32> to vector<8x32xf32>
    %c0_2 = arith.constant 0 : index
    %c0_3 = arith.constant 0 : index
    %2 = vector.load %arg2[%c0_2, %c0_3] : memref<1x32xf32, #tpu.memory_space<vmem>>, vector<1x32xf32>
    %c0_4 = arith.constant 0 : index
    %c0_5 = arith.constant 0 : index
    %3 = vector.load %arg3[%c0_4, %c0_5] : memref<1x32xf32, #tpu.memory_space<vmem>>, vector<1x32xf32>
    %cst = arith.constant dense<0.000000e+00> : vector<8xf32>
    %4 = vector.multi_reduction <add>, %1, %cst [1] : vector<8x32xf32> to vector<8xf32>
    %5 = vector.shape_cast %4 : vector<8xf32> to vector<8x1xf32>
    %cst_6 = arith.constant 3.200000e+01 : f32
    %6 = vector.broadcast %cst_6 : f32 to vector<8x1xf32>
    %7 = arith.divf %5, %6 : vector<8x1xf32>
    %8 = vector.broadcast %7 : vector<8x1xf32> to vector<8x32xf32>
    %9 = arith.subf %1, %8 : vector<8x32xf32>
    %10 = arith.mulf %9, %9 : vector<8x32xf32>
    %cst_7 = arith.constant dense<0.000000e+00> : vector<8xf32>
    %11 = vector.multi_reduction <add>, %10, %cst_7 [1] : vector<8x32xf32> to vector<8xf32>
    %12 = vector.shape_cast %11 : vector<8xf32> to vector<8x1xf32>
    %cst_8 = arith.constant 3.200000e+01 : f32
    %13 = vector.broadcast %cst_8 : f32 to vector<8x1xf32>
    %14 = arith.divf %12, %13 : vector<8x1xf32>
    %15 = vector.broadcast %7 : vector<8x1xf32> to vector<8x32xf32>
    %16 = arith.subf %1, %15 : vector<8x32xf32>
    %cst_9 = arith.constant 9.99999974E-6 : f32
    %17 = vector.broadcast %cst_9 : f32 to vector<8x1xf32>
    %18 = arith.addf %14, %17 : vector<8x1xf32>
    %19 = math.rsqrt %18 : vector<8x1xf32>
    %20 = vector.broadcast %19 : vector<8x1xf32> to vector<8x32xf32>
    %21 = arith.mulf %16, %20 : vector<8x32xf32>
    %22 = vector.broadcast %2 : vector<1x32xf32> to vector<8x32xf32>
    %23 = arith.mulf %21, %22 : vector<8x32xf32>
    %24 = vector.broadcast %3 : vector<1x32xf32> to vector<8x32xf32>
    %25 = arith.addf %23, %24 : vector<8x32xf32>
    %26 = arith.truncf %25 : vector<8x32xf32> to vector<8x32xbf16>
    %c0_10 = arith.constant 0 : index
    %c0_11 = arith.constant 0 : index
    %27 = vector.load %arg4[%c0_10, %c0_11] : memref<32x96xbf16, #tpu.memory_space<vmem>>, vector<32x96xbf16>
    %cst_12 = arith.constant dense<0.000000e+00> : vector<8x96xf32>
    %28 = tpu.matmul %26, %27, %cst_12 {dimension_numbers = #tpu.dot_dimension_numbers<[1], [0], [0], [1], [0, 0, 1, 1], [], []>} : vector<8x32xbf16>, vector<32x96xbf16>, vector<8x96xf32> -> vector<8x96xf32>
    %c0_13 = arith.constant 0 : index
    %c0_14 = arith.constant 0 : index
    %29 = vector.load %arg5[%c0_13, %c0_14] : memref<1x96xf32, #tpu.memory_space<vmem>>, vector<1x96xf32>
    %30 = vector.broadcast %29 : vector<1x96xf32> to vector<8x96xf32>
    %31 = arith.addf %28, %30 : vector<8x96xf32>
    %32 = arith.truncf %31 : vector<8x96xf32> to vector<8x96xbf16>
    %33 = vector.extract_strided_slice %32 {offsets = [0, 0], sizes = [8, 8], strides = [1, 1]} : vector<8x96xbf16> to vector<8x8xbf16>
    %34 = vector.extract_strided_slice %32 {offsets = [0, 32], sizes = [8, 8], strides = [1, 1]} : vector<8x96xbf16> to vector<8x8xbf16>
    %35 = vector.extract_strided_slice %32 {offsets = [0, 64], sizes = [8, 8], strides = [1, 1]} : vector<8x96xbf16> to vector<8x8xbf16>
    %cst_15 = arith.constant dense<0.000000e+00> : vector<8x8xf32>
    %36 = tpu.matmul %33, %34, %cst_15 {dimension_numbers = #tpu.dot_dimension_numbers<[1], [1], [0], [0], [0, 0, 1, 0], [], []>} : vector<8x8xbf16>, vector<8x8xbf16>, vector<8x8xf32> -> vector<8x8xf32>
    %cst_16 = arith.constant dense<0xFF800000> : vector<8xf32>
    %37 = vector.multi_reduction <maximumf>, %36, %cst_16 [1] : vector<8x8xf32> to vector<8xf32>
    %38 = vector.shape_cast %37 : vector<8xf32> to vector<8x1xf32>
    %39 = vector.broadcast %38 : vector<8x1xf32> to vector<8x8xf32>
    %40 = arith.subf %36, %39 : vector<8x8xf32>
    %41 = math.exp %40 : vector<8x8xf32>
    %cst_17 = arith.constant dense<0.000000e+00> : vector<8xf32>
    %42 = vector.multi_reduction <add>, %41, %cst_17 [1] : vector<8x8xf32> to vector<8xf32>
    %43 = vector.shape_cast %42 : vector<8xf32> to vector<8x1xf32>
    %44 = tpu.reciprocal %43 {approx = true} : vector<8x1xf32> -> vector<8x1xf32>
    %45 = vector.broadcast %44 : vector<8x1xf32> to vector<8x8xf32>
    %46 = arith.mulf %41, %45 : vector<8x8xf32>
    %47 = arith.truncf %46 : vector<8x8xf32> to vector<8x8xbf16>
    %cst_18 = arith.constant dense<0.000000e+00> : vector<8x8xf32>
    %48 = tpu.matmul %47, %35, %cst_18 {dimension_numbers = #tpu.dot_dimension_numbers<[1], [0], [0], [1], [0, 0, 1, 1], [], []>} : vector<8x8xbf16>, vector<8x8xbf16>, vector<8x8xf32> -> vector<8x8xf32>
    %49 = vector.extract_strided_slice %32 {offsets = [0, 8], sizes = [8, 8], strides = [1, 1]} : vector<8x96xbf16> to vector<8x8xbf16>
    %50 = vector.extract_strided_slice %32 {offsets = [0, 40], sizes = [8, 8], strides = [1, 1]} : vector<8x96xbf16> to vector<8x8xbf16>
    %51 = vector.extract_strided_slice %32 {offsets = [0, 72], sizes = [8, 8], strides = [1, 1]} : vector<8x96xbf16> to vector<8x8xbf16>
    %cst_19 = arith.constant dense<0.000000e+00> : vector<8x8xf32>
    %52 = tpu.matmul %49, %50, %cst_19 {dimension_numbers = #tpu.dot_dimension_numbers<[1], [1], [0], [0], [0, 0, 1, 0], [], []>} : vector<8x8xbf16>, vector<8x8xbf16>, vector<8x8xf32> -> vector<8x8xf32>
    %cst_20 = arith.constant dense<0xFF800000> : vector<8xf32>
    %53 = vector.multi_reduction <maximumf>, %52, %cst_20 [1] : vector<8x8xf32> to vector<8xf32>
    %54 = vector.shape_cast %53 : vector<8xf32> to vector<8x1xf32>
    %55 = vector.broadcast %54 : vector<8x1xf32> to vector<8x8xf32>
    %56 = arith.subf %52, %55 : vector<8x8xf32>
    %57 = math.exp %56 : vector<8x8xf32>
    %cst_21 = arith.constant dense<0.000000e+00> : vector<8xf32>
    %58 = vector.multi_reduction <add>, %57, %cst_21 [1] : vector<8x8xf32> to vector<8xf32>
    %59 = vector.shape_cast %58 : vector<8xf32> to vector<8x1xf32>
    %60 = tpu.reciprocal %59 {approx = true} : vector<8x1xf32> -> vector<8x1xf32>
    %61 = vector.broadcast %60 : vector<8x1xf32> to vector<8x8xf32>
    %62 = arith.mulf %57, %61 : vector<8x8xf32>
    %63 = arith.truncf %62 : vector<8x8xf32> to vector<8x8xbf16>
    %cst_22 = arith.constant dense<0.000000e+00> : vector<8x8xf32>
    %64 = tpu.matmul %63, %51, %cst_22 {dimension_numbers = #tpu.dot_dimension_numbers<[1], [0], [0], [1], [0, 0, 1, 1], [], []>} : vector<8x8xbf16>, vector<8x8xbf16>, vector<8x8xf32> -> vector<8x8xf32>
    %65 = vector.extract_strided_slice %32 {offsets = [0, 16], sizes = [8, 8], strides = [1, 1]} : vector<8x96xbf16> to vector<8x8xbf16>
    %66 = vector.extract_strided_slice %32 {offsets = [0, 48], sizes = [8, 8], strides = [1, 1]} : vector<8x96xbf16> to vector<8x8xbf16>
    %67 = vector.extract_strided_slice %32 {offsets = [0, 80], sizes = [8, 8], strides = [1, 1]} : vector<8x96xbf16> to vector<8x8xbf16>
    %cst_23 = arith.constant dense<0.000000e+00> : vector<8x8xf32>
    %68 = tpu.matmul %65, %66, %cst_23 {dimension_numbers = #tpu.dot_dimension_numbers<[1], [1], [0], [0], [0, 0, 1, 0], [], []>} : vector<8x8xbf16>, vector<8x8xbf16>, vector<8x8xf32> -> vector<8x8xf32>
    %cst_24 = arith.constant dense<0xFF800000> : vector<8xf32>
    %69 = vector.multi_reduction <maximumf>, %68, %cst_24 [1] : vector<8x8xf32> to vector<8xf32>
    %70 = vector.shape_cast %69 : vector<8xf32> to vector<8x1xf32>
    %71 = vector.broadcast %70 : vector<8x1xf32> to vector<8x8xf32>
    %72 = arith.subf %68, %71 : vector<8x8xf32>
    %73 = math.exp %72 : vector<8x8xf32>
    %cst_25 = arith.constant dense<0.000000e+00> : vector<8xf32>
    %74 = vector.multi_reduction <add>, %73, %cst_25 [1] : vector<8x8xf32> to vector<8xf32>
    %75 = vector.shape_cast %74 : vector<8xf32> to vector<8x1xf32>
    %76 = tpu.reciprocal %75 {approx = true} : vector<8x1xf32> -> vector<8x1xf32>
    %77 = vector.broadcast %76 : vector<8x1xf32> to vector<8x8xf32>
    %78 = arith.mulf %73, %77 : vector<8x8xf32>
    %79 = arith.truncf %78 : vector<8x8xf32> to vector<8x8xbf16>
    %cst_26 = arith.constant dense<0.000000e+00> : vector<8x8xf32>
    %80 = tpu.matmul %79, %67, %cst_26 {dimension_numbers = #tpu.dot_dimension_numbers<[1], [0], [0], [1], [0, 0, 1, 1], [], []>} : vector<8x8xbf16>, vector<8x8xbf16>, vector<8x8xf32> -> vector<8x8xf32>
    %81 = vector.extract_strided_slice %32 {offsets = [0, 24], sizes = [8, 8], strides = [1, 1]} : vector<8x96xbf16> to vector<8x8xbf16>
    %82 = vector.extract_strided_slice %32 {offsets = [0, 56], sizes = [8, 8], strides = [1, 1]} : vector<8x96xbf16> to vector<8x8xbf16>
    %83 = vector.extract_strided_slice %32 {offsets = [0, 88], sizes = [8, 8], strides = [1, 1]} : vector<8x96xbf16> to vector<8x8xbf16>
    %cst_27 = arith.constant dense<0.000000e+00> : vector<8x8xf32>
    %84 = tpu.matmul %81, %82, %cst_27 {dimension_numbers = #tpu.dot_dimension_numbers<[1], [1], [0], [0], [0, 0, 1, 0], [], []>} : vector<8x8xbf16>, vector<8x8xbf16>, vector<8x8xf32> -> vector<8x8xf32>
    %cst_28 = arith.constant dense<0xFF800000> : vector<8xf32>
    %85 = vector.multi_reduction <maximumf>, %84, %cst_28 [1] : vector<8x8xf32> to vector<8xf32>
    %86 = vector.shape_cast %85 : vector<8xf32> to vector<8x1xf32>
    %87 = vector.broadcast %86 : vector<8x1xf32> to vector<8x8xf32>
    %88 = arith.subf %84, %87 : vector<8x8xf32>
    %89 = math.exp %88 : vector<8x8xf32>
    %cst_29 = arith.constant dense<0.000000e+00> : vector<8xf32>
    %90 = vector.multi_reduction <add>, %89, %cst_29 [1] : vector<8x8xf32> to vector<8xf32>
    %91 = vector.shape_cast %90 : vector<8xf32> to vector<8x1xf32>
    %92 = tpu.reciprocal %91 {approx = true} : vector<8x1xf32> -> vector<8x1xf32>
    %93 = vector.broadcast %92 : vector<8x1xf32> to vector<8x8xf32>
    %94 = arith.mulf %89, %93 : vector<8x8xf32>
    %95 = arith.truncf %94 : vector<8x8xf32> to vector<8x8xbf16>
    %cst_30 = arith.constant dense<0.000000e+00> : vector<8x8xf32>
    %96 = tpu.matmul %95, %83, %cst_30 {dimension_numbers = #tpu.dot_dimension_numbers<[1], [0], [0], [1], [0, 0, 1, 1], [], []>} : vector<8x8xbf16>, vector<8x8xbf16>, vector<8x8xf32> -> vector<8x8xf32>
    %97 = tpu.concatenate %48, %64, %80, %96 in 1 : vector<8x8xf32>, vector<8x8xf32>, vector<8x8xf32>, vector<8x8xf32> -> vector<8x32xf32>
    %98 = arith.truncf %97 : vector<8x32xf32> to vector<8x32xbf16>
    %c0_31 = arith.constant 0 : index
    %c0_32 = arith.constant 0 : index
    %99 = vector.load %arg6[%c0_31, %c0_32] : memref<32x32xbf16, #tpu.memory_space<vmem>>, vector<32x32xbf16>
    %cst_33 = arith.constant dense<0.000000e+00> : vector<8x32xf32>
    %100 = tpu.matmul %98, %99, %cst_33 {dimension_numbers = #tpu.dot_dimension_numbers<[1], [0], [0], [1], [0, 0, 1, 1], [], []>} : vector<8x32xbf16>, vector<32x32xbf16>, vector<8x32xf32> -> vector<8x32xf32>
    %c0_34 = arith.constant 0 : index
    %c0_35 = arith.constant 0 : index
    %101 = vector.load %arg7[%c0_34, %c0_35] : memref<1x32xf32, #tpu.memory_space<vmem>>, vector<1x32xf32>
    %102 = vector.broadcast %101 : vector<1x32xf32> to vector<8x32xf32>
    %103 = arith.addf %100, %102 : vector<8x32xf32>
    %104 = arith.addf %1, %103 : vector<8x32xf32>
    %c0_36 = arith.constant 0 : index
    %c0_37 = arith.constant 0 : index
    %105 = vector.load %arg8[%c0_36, %c0_37] : memref<1x32xf32, #tpu.memory_space<vmem>>, vector<1x32xf32>
    %c0_38 = arith.constant 0 : index
    %c0_39 = arith.constant 0 : index
    %106 = vector.load %arg9[%c0_38, %c0_39] : memref<1x32xf32, #tpu.memory_space<vmem>>, vector<1x32xf32>
    %cst_40 = arith.constant dense<0.000000e+00> : vector<8xf32>
    %107 = vector.multi_reduction <add>, %104, %cst_40 [1] : vector<8x32xf32> to vector<8xf32>
    %108 = vector.shape_cast %107 : vector<8xf32> to vector<8x1xf32>
    %cst_41 = arith.constant 3.200000e+01 : f32
    %109 = vector.broadcast %cst_41 : f32 to vector<8x1xf32>
    %110 = arith.divf %108, %109 : vector<8x1xf32>
    %111 = vector.broadcast %110 : vector<8x1xf32> to vector<8x32xf32>
    %112 = arith.subf %104, %111 : vector<8x32xf32>
    %113 = arith.mulf %112, %112 : vector<8x32xf32>
    %cst_42 = arith.constant dense<0.000000e+00> : vector<8xf32>
    %114 = vector.multi_reduction <add>, %113, %cst_42 [1] : vector<8x32xf32> to vector<8xf32>
    %115 = vector.shape_cast %114 : vector<8xf32> to vector<8x1xf32>
    %cst_43 = arith.constant 3.200000e+01 : f32
    %116 = vector.broadcast %cst_43 : f32 to vector<8x1xf32>
    %117 = arith.divf %115, %116 : vector<8x1xf32>
    %118 = vector.broadcast %110 : vector<8x1xf32> to vector<8x32xf32>
    %119 = arith.subf %104, %118 : vector<8x32xf32>
    %cst_44 = arith.constant 9.99999974E-6 : f32
    %120 = vector.broadcast %cst_44 : f32 to vector<8x1xf32>
    %121 = arith.addf %117, %120 : vector<8x1xf32>
    %122 = math.rsqrt %121 : vector<8x1xf32>
    %123 = vector.broadcast %122 : vector<8x1xf32> to vector<8x32xf32>
    %124 = arith.mulf %119, %123 : vector<8x32xf32>
    %125 = vector.broadcast %105 : vector<1x32xf32> to vector<8x32xf32>
    %126 = arith.mulf %124, %125 : vector<8x32xf32>
    %127 = vector.broadcast %106 : vector<1x32xf32> to vector<8x32xf32>
    %128 = arith.addf %126, %127 : vector<8x32xf32>
    %129 = arith.truncf %128 : vector<8x32xf32> to vector<8x32xbf16>
    %c0_45 = arith.constant 0 : index
    %c0_46 = arith.constant 0 : index
    %130 = vector.load %arg10[%c0_45, %c0_46] : memref<32x128xbf16, #tpu.memory_space<vmem>>, vector<32x128xbf16>
    %cst_47 = arith.constant dense<0.000000e+00> : vector<8x128xf32>
    %131 = tpu.matmul %129, %130, %cst_47 {dimension_numbers = #tpu.dot_dimension_numbers<[1], [0], [0], [1], [0, 0, 1, 1], [], []>} : vector<8x32xbf16>, vector<32x128xbf16>, vector<8x128xf32> -> vector<8x128xf32>
    %c0_48 = arith.constant 0 : index
    %c0_49 = arith.constant 0 : index
    %132 = vector.load %arg11[%c0_48, %c0_49] : memref<1x128xf32, #tpu.memory_space<vmem>>, vector<1x128xf32>
    %133 = vector.broadcast %132 : vector<1x128xf32> to vector<8x128xf32>
    %134 = arith.addf %131, %133 : vector<8x128xf32>
    %cst_50 = arith.constant 0.000000e+00 : f32
    %135 = vector.broadcast %cst_50 : f32 to vector<8x128xf32>
    %136 = arith.maximumf %134, %135 : vector<8x128xf32>
    %137 = arith.truncf %136 : vector<8x128xf32> to vector<8x128xbf16>
    %c0_51 = arith.constant 0 : index
    %c0_52 = arith.constant 0 : index
    %138 = vector.load %arg12[%c0_51, %c0_52] : memref<128x32xbf16, #tpu.memory_space<vmem>>, vector<128x32xbf16>
    %cst_53 = arith.constant dense<0.000000e+00> : vector<8x32xf32>
    %139 = tpu.matmul %137, %138, %cst_53 {dimension_numbers = #tpu.dot_dimension_numbers<[1], [0], [0], [1], [0, 0, 1, 1], [], []>} : vector<8x128xbf16>, vector<128x32xbf16>, vector<8x32xf32> -> vector<8x32xf32>
    %c0_54 = arith.constant 0 : index
    %c0_55 = arith.constant 0 : index
    %140 = vector.load %arg13[%c0_54, %c0_55] : memref<1x32xf32, #tpu.memory_space<vmem>>, vector<1x32xf32>
    %141 = vector.broadcast %140 : vector<1x32xf32> to vector<8x32xf32>
    %142 = arith.addf %139, %141 : vector<8x32xf32>
    %143 = arith.addf %104, %142 : vector<8x32xf32>
    %c0_56 = arith.constant 0 : index
    %c0_57 = arith.constant 0 : index
    %c0_58 = arith.constant 0 : index
    %144 = vector.load %arg14[%c0_56, %c0_57, %c0_58] : memref<1x8x32xf32, #tpu.memory_space<vmem>>, vector<1x8x32xf32>
    %145 = vector.shape_cast %144 : vector<1x8x32xf32> to vector<8x32xf32>
    %146 = vector.shape_cast %143 : vector<8x32xf32> to vector<1x8x32xf32>
    tpu.vector_store %arg14[%c0_56, %c0_57, %c0_58], %146 {strides = array<i32>} : memref<1x8x32xf32, #tpu.memory_space<vmem>>, vector<1x8x32xf32>,
    return
  }
  func.func @transform_0(%arg0: i32) -> (i32, i32, i32) {
    %c0_i32 = arith.constant 0 : i32
    %c0_i32_0 = arith.constant 0 : i32
    %c0_i32_1 = arith.constant 0 : i32
    return %arg0, %c0_i32, %c0_i32_0 : i32, i32, i32
  }
  func.func @transform_1(%arg0: i32) -> (i32, i32) {
    %c0_i32 = arith.constant 0 : i32
    %c0_i32_0 = arith.constant 0 : i32
    %c0_i32_1 = arith.constant 0 : i32
    return %c0_i32, %c0_i32_0 : i32, i32
  }
  func.func @transform_2(%arg0: i32) -> (i32, i32) {
    %c0_i32 = arith.constant 0 : i32
    %c0_i32_0 = arith.constant 0 : i32
    %c0_i32_1 = arith.constant 0 : i32
    return %c0_i32, %c0_i32_0 : i32, i32
  }
  func.func @transform_3(%arg0: i32) -> (i32, i32) {
    %c0_i32 = arith.constant 0 : i32
    %c0_i32_0 = arith.constant 0 : i32
    %c0_i32_1 = arith.constant 0 : i32
    return %c0_i32, %c0_i32_0 : i32, i32
  }
  func.func @transform_4(%arg0: i32) -> (i32, i32) {
    %c0_i32 = arith.constant 0 : i32
    %c0_i32_0 = arith.constant 0 : i32
    %c0_i32_1 = arith.constant 0 : i32
    return %c0_i32, %c0_i32_0 : i32, i32
  }
  func.func @transform_5(%arg0: i32) -> (i32, i32) {
    %c0_i32 = arith.constant 0 : i32
    %c0_i32_0 = arith.constant 0 : i32
    %c0_i32_1 = arith.constant 0 : i32
    return %c0_i32, %c0_i32_0 : i32, i32
  }
  func.func @transform_6(%arg0: i32) -> (i32, i32) {
    %c0_i32 = arith.constant 0 : i32
    %c0_i32_0 = arith.constant 0 : i32
    %c0_i32_1 = arith.constant 0 : i32
    return %c0_i32, %c0_i32_0 : i32, i32
  }
  func.func @transform_7(%arg0: i32) -> (i32, i32) {
    %c0_i32 = arith.constant 0 : i32
    %c0_i32_0 = arith.constant 0 : i32
    %c0_i32_1 = arith.constant 0 : i32
    return %c0_i32, %c0_i32_0 : i32, i32
  }
  func.func @transform_8(%arg0: i32) -> (i32, i32) {
    %c0_i32 = arith.constant 0 : i32
    %c0_i32_0 = arith.constant 0 : i32
    %c0_i32_1 = arith.constant 0 : i32
    return %c0_i32, %c0_i32_0 : i32, i32
  }
  func.func @transform_9(%arg0: i32) -> (i32, i32) {
    %c0_i32 = arith.constant 0 : i32
    %c0_i32_0 = arith.constant 0 : i32
    %c0_i32_1 = arith.constant 0 : i32
    return %c0_i32, %c0_i32_0 : i32, i32
  }
  func.func @transform_10(%arg0: i32) -> (i32, i32) {
    %c0_i32 = arith.constant 0 : i32
    %c0_i32_0 = arith.constant 0 : i32
    %c0_i32_1 = arith.constant 0 : i32
    return %c0_i32, %c0_i32_0 : i32, i32
  }
  func.func @transform_11(%arg0: i32) -> (i32, i32) {
    %c0_i32 = arith.constant 0 : i32
    %c0_i32_0 = arith.constant 0 : i32
    %c0_i32_1 = arith.constant 0 : i32
    return %c0_i32, %c0_i32_0 : i32, i32
  }
  func.func @transform_12(%arg0: i32) -> (i32, i32) {
    %c0_i32 = arith.constant 0 : i32
    %c0_i32_0 = arith.constant 0 : i32
    %c0_i32_1 = arith.constant 0 : i32
    return %c0_i32, %c0_i32_0 : i32, i32
  }
  func.func @transform_13(%arg0: i32) -> (i32, i32, i32) {
    %c0_i32 = arith.constant 0 : i32
    %c0_i32_0 = arith.constant 0 : i32
    %c0_i32_1 = arith.constant 0 : i32
    return %arg0, %c0_i32, %c0_i32_0 : i32, i32, i32
  }
}

module attributes {stable_mosaic.version = 11 : i64} {
  func.func @_layer_kernel(%arg0: i32, %arg1: memref<1x8x32xf32, #tpu.memory_space<vmem>>, %arg2: memref<1x32xf32, #tpu.memory_space<vmem>>, %arg3: memref<1x32xf32, #tpu.memory_space<vmem>>, %arg4: memref<32x96xbf16, #tpu.memory_space<vmem>>, %arg5: memref<1x96xf32, #tpu.memory_space<vmem>>, %arg6: memref<32x32xbf16, #tpu.memory_space<vmem>>, %arg7: memref<1x32xf32, #tpu.memory_space<vmem>>, %arg8: memref<1x32xf32, #tpu.memory_space<vmem>>, %arg9: memref<1x32xf32, #tpu.memory_space<vmem>>, %arg10: memref<32x128xbf16, #tpu.memory_space<vmem>>, %arg11: memref<1x128xf32, #tpu.memory_space<vmem>>, %arg12: memref<128x32xbf16, #tpu.memory_space<vmem>>, %arg13: memref<1x32xf32, #tpu.memory_space<vmem>>, %arg14: memref<1x8x32xf32, #tpu.memory_space<vmem>>) attributes {dimension_semantics = [#tpu.dimension_semantics<parallel>], iteration_bounds = array<i64: 2>, scalar_prefetch = 0 : i64, scratch_operands = 0 : i64, tpu.core_type = #tpu.core_type<tc>, window_params = [{transform_indices = @transform_0, window_bounds = array<i64: 1, 8, 32>}, {pipeline_mode = #tpu.pipeline_mode<synchronous>, transform_indices = @transform_1, window_bounds = array<i64: 1, 32>}, {pipeline_mode = #tpu.pipeline_mode<synchronous>, transform_indices = @transform_2, window_bounds = array<i64: 1, 32>}, {pipeline_mode = #tpu.pipeline_mode<synchronous>, transform_indices = @transform_3, window_bounds = array<i64: 32, 96>}, {pipeline_mode = #tpu.pipeline_mode<synchronous>, transform_indices = @transform_4, window_bounds = array<i64: 1, 96>}, {pipeline_mode = #tpu.pipeline_mode<synchronous>, transform_indices = @transform_5, window_bounds = array<i64: 32, 32>}, {pipeline_mode = #tpu.pipeline_mode<synchronous>, transform_indices = @transform_6, window_bounds = array<i64: 1, 32>}, {pipeline_mode = #tpu.pipeline_mode<synchronous>, transform_indices = @transform_7, window_bounds = array<i64: 1, 32>}, {pipeline_mode = #tpu.pipeline_mode<synchronous>, transform_indices = @transform_8, window_bounds = array<i64: 1, 32>}, {pipeline_mode = #tpu.pipeline_mode<synchronous>, transform_indices = @transform_9, window_bounds = array<i64: 32, 128>}, {pipeline_mode = #tpu.pipeline_mode<synchronous>, transform_indices = @transform_10, window_bounds = array<i64: 1, 128>}, {pipeline_mode = #tpu.pipeline_mode<synchronous>, transform_indices = @transform_11, window_bounds = array<i64: 128, 32>}, {pipeline_mode = #tpu.pipeline_mode<synchronous>, transform_indices = @transform_12, window_bounds = array<i64: 1, 32>}, {transform_indices = @transform_13, window_bounds = array<i64: 1, 8, 32>}]} {
    %c0 = arith.constant 0 : index
    %c0_0 = arith.constant 0 : index
    %c0_1 = arith.constant 0 : index
    %0 = vector.load %arg1[%c0, %c0_0, %c0_1] : memref<1x8x32xf32, #tpu.memory_space<vmem>>, vector<1x8x32xf32>
    %1 = vector.shape_cast %0 : vector<1x8x32xf32> to vector<8x32xf32>
    %c0_2 = arith.constant 0 : index
    %c0_3 = arith.constant 0 : index
    %2 = vector.load %arg2[%c0_2, %c0_3] : memref<1x32xf32, #tpu.memory_space<vmem>>, vector<1x32xf32>
    %c0_4 = arith.constant 0 : index
    %c0_5 = arith.constant 0 : index
    %3 = vector.load %arg3[%c0_4, %c0_5] : memref<1x32xf32, #tpu.memory_space<vmem>>, vector<1x32xf32>
    %cst = arith.constant dense<0.000000e+00> : vector<8xf32>
    %4 = vector.multi_reduction <add>, %1, %cst [1] : vector<8x32xf32> to vector<8xf32>
    %5 = vector.shape_cast %4 : vector<8xf32> to vector<8x1xf32>
    %cst_6 = arith.constant 3.200000e+01 : f32
    %6 = vector.broadcast %cst_6 : f32 to vector<8x1xf32>
    %7 = arith.divf %5, %6 : vector<8x1xf32>
    %8 = vector.broadcast %7 : vector<8x1xf32> to vector<8x32xf32>
    %9 = arith.subf %1, %8 : vector<8x32xf32>
    %10 = arith.mulf %9, %9 : vector<8x32xf32>
    %cst_7 = arith.constant dense<0.000000e+00> : vector<8xf32>
    %11 = vector.multi_reduction <add>, %10, %cst_7 [1] : vector<8x32xf32> to vector<8xf32>
    %12 = vector.shape_cast %11 : vector<8xf32> to vector<8x1xf32>
    %cst_8 = arith.constant 3.200000e+01 : f32
    %13 = vector.broadcast %cst_8 : f32 to vector<8x1xf32>
    %14 = arith.divf %12, %13 : vector<8x1xf32>
    %15 = vector.broadcast %7 : vector<8x1xf32> to vector<8x32xf32>
    %16 = arith.subf %1, %15 : vector<8x32xf32>
    %cst_9 = arith.constant 9.99999974E-6 : f32
    %17 = vector.broadcast %cst_9 : f32 to vector<8x1xf32>
    %18 = arith.addf %14, %17 : vector<8x1xf32>
    %19 = math.rsqrt %18 : vector<8x1xf32>
    %20 = vector.broadcast %19 : vector<8x1xf32> to vector<8x32xf32>
    %21 = arith.mulf %16, %20 : vector<8x32xf32>
    %22 = vector.broadcast %2 : vector<1x32xf32> to vector<8x32xf32>
    %23 = arith.mulf %21, %22 : vector<8x32xf32>
    %24 = vector.broadcast %3 : vector<1x32xf32> to vector<8x32xf32>
    %25 = arith.addf %23, %24 : vector<8x32xf32>
    %26 = arith.truncf %25 : vector<8x32xf32> to vector<8x32xbf16>
    %c0_10 = arith.constant 0 : index
    %c0_11 = arith.constant 0 : index
    %27 = vector.load %arg4[%c0_10, %c0_11] : memref<32x96xbf16, #tpu.memory_space<vmem>>, vector<32x96xbf16>
    %cst_12 = arith.constant dense<0.000000e+00> : vector<8x96xf32>
    %28 = tpu.matmul %26, %27, %cst_12 {dimension_numbers = #tpu.dot_dimension_numbers<[1], [0], [0], [1], [0, 0, 1, 1], [], []>} : vector<8x32xbf16>, vector<32x96xbf16>, vector<8x96xf32> -> vector<8x96xf32>
    %c0_13 = arith.constant 0 : index
    %c0_14 = arith.constant 0 : index
    %29 = vector.load %arg5[%c0_13, %c0_14] : memref<1x96xf32, #tpu.memory_space<vmem>>, vector<1x96xf32>
    %30 = vector.broadcast %29 : vector<1x96xf32> to vector<8x96xf32>
    %31 = arith.addf %28, %30 : vector<8x96xf32>
    %32 = arith.truncf %31 : vector<8x96xf32> to vector<8x96xbf16>
    %33 = vector.extract_strided_slice %32 {offsets = [0, 0], sizes = [8, 8], strides = [1, 1]} : vector<8x96xbf16> to vector<8x8xbf16>
    %34 = vector.extract_strided_slice %32 {offsets = [0, 32], sizes = [8, 8], strides = [1, 1]} : vector<8x96xbf16> to vector<8x8xbf16>
    %35 = vector.extract_strided_slice %32 {offsets = [0, 64], sizes = [8, 8], strides = [1, 1]} : vector<8x96xbf16> to vector<8x8xbf16>
    %cst_15 = arith.constant dense<0.000000e+00> : vector<8x8xf32>
    %36 = tpu.matmul %33, %34, %cst_15 {dimension_numbers = #tpu.dot_dimension_numbers<[1], [1], [0], [0], [0, 0, 1, 0], [], []>} : vector<8x8xbf16>, vector<8x8xbf16>, vector<8x8xf32> -> vector<8x8xf32>
    %cst_16 = arith.constant dense<0xFF800000> : vector<8xf32>
    %37 = vector.multi_reduction <maximumf>, %36, %cst_16 [1] : vector<8x8xf32> to vector<8xf32>
    %38 = vector.shape_cast %37 : vector<8xf32> to vector<8x1xf32>
    %39 = vector.broadcast %38 : vector<8x1xf32> to vector<8x8xf32>
    %40 = arith.subf %36, %39 : vector<8x8xf32>
    %41 = math.exp %40 : vector<8x8xf32>
    %cst_17 = arith.constant dense<0.000000e+00> : vector<8xf32>
    %42 = vector.multi_reduction <add>, %41, %cst_17 [1] : vector<8x8xf32> to vector<8xf32>
    %43 = vector.shape_cast %42 : vector<8xf32> to vector<8x1xf32>
    %44 = tpu.reciprocal %43 {approx = true} : vector<8x1xf32> -> vector<8x1xf32>
    %45 = vector.broadcast %44 : vector<8x1xf32> to vector<8x8xf32>
    %46 = arith.mulf %41, %45 : vector<8x8xf32>
    %47 = arith.truncf %46 : vector<8x8xf32> to vector<8x8xbf16>
    %cst_18 = arith.constant dense<0.000000e+00> : vector<8x8xf32>
    %48 = tpu.matmul %47, %35, %cst_18 {dimension_numbers = #tpu.dot_dimension_numbers<[1], [0], [0], [1], [0, 0, 1, 1], [], []>} : vector<8x8xbf16>, vector<8x8xbf16>, vector<8x8xf32> -> vector<8x8xf32>
    %49 = vector.extract_strided_slice %32 {offsets = [0, 8], sizes = [8, 8], strides = [1, 1]} : vector<8x96xbf16> to vector<8x8xbf16>
    %50 = vector.extract_strided_slice %32 {offsets = [0, 40], sizes = [8, 8], strides = [1, 1]} : vector<8x96xbf16> to vector<8x8xbf16>
    %51 = vector.extract_strided_slice %32 {offsets = [0, 72], sizes = [8, 8], strides = [1, 1]} : vector<8x96xbf16> to vector<8x8xbf16>
    %cst_19 = arith.constant dense<0.000000e+00> : vector<8x8xf32>
    %52 = tpu.matmul %49, %50, %cst_19 {dimension_numbers = #tpu.dot_dimension_numbers<[1], [1], [0], [0], [0, 0, 1, 0], [], []>} : vector<8x8xbf16>, vector<8x8xbf16>, vector<8x8xf32> -> vector<8x8xf32>
    %cst_20 = arith.constant dense<0xFF800000> : vector<8xf32>
    %53 = vector.multi_reduction <maximumf>, %52, %cst_20 [1] : vector<8x8xf32> to vector<8xf32>
    %54 = vector.shape_cast %53 : vector<8xf32> to vector<8x1xf32>
    %55 = vector.broadcast %54 : vector<8x1xf32> to vector<8x8xf32>
    %56 = arith.subf %52, %55 : vector<8x8xf32>
    %57 = math.exp %56 : vector<8x8xf32>
    %cst_21 = arith.constant dense<0.000000e+00> : vector<8xf32>
    %58 = vector.multi_reduction <add>, %57, %cst_21 [1] : vector<8x8xf32> to vector<8xf32>
    %59 = vector.shape_cast %58 : vector<8xf32> to vector<8x1xf32>
    %60 = tpu.reciprocal %59 {approx = true} : vector<8x1xf32> -> vector<8x1xf32>
    %61 = vector.broadcast %60 : vector<8x1xf32> to vector<8x8xf32>
    %62 = arith.mulf %57, %61 : vector<8x8xf32>
    %63 = arith.truncf %62 : vector<8x8xf32> to vector<8x8xbf16>
    %cst_22 = arith.constant dense<0.000000e+00> : vector<8x8xf32>
    %64 = tpu.matmul %63, %51, %cst_22 {dimension_numbers = #tpu.dot_dimension_numbers<[1], [0], [0], [1], [0, 0, 1, 1], [], []>} : vector<8x8xbf16>, vector<8x8xbf16>, vector<8x8xf32> -> vector<8x8xf32>
    %65 = vector.extract_strided_slice %32 {offsets = [0, 16], sizes = [8, 8], strides = [1, 1]} : vector<8x96xbf16> to vector<8x8xbf16>
    %66 = vector.extract_strided_slice %32 {offsets = [0, 48], sizes = [8, 8], strides = [1, 1]} : vector<8x96xbf16> to vector<8x8xbf16>
    %67 = vector.extract_strided_slice %32 {offsets = [0, 80], sizes = [8, 8], strides = [1, 1]} : vector<8x96xbf16> to vector<8x8xbf16>
    %cst_23 = arith.constant dense<0.000000e+00> : vector<8x8xf32>
    %68 = tpu.matmul %65, %66, %cst_23 {dimension_numbers = #tpu.dot_dimension_numbers<[1], [1], [0], [0], [0, 0, 1, 0], [], []>} : vector<8x8xbf16>, vector<8x8xbf16>, vector<8x8xf32> -> vector<8x8xf32>
    %cst_24 = arith.constant dense<0xFF800000> : vector<8xf32>
    %69 = vector.multi_reduction <maximumf>, %68, %cst_24 [1] : vector<8x8xf32> to vector<8xf32>
    %70 = vector.shape_cast %69 : vector<8xf32> to vector<8x1xf32>
    %71 = vector.broadcast %70 : vector<8x1xf32> to vector<8x8xf32>
    %72 = arith.subf %68, %71 : vector<8x8xf32>
    %73 = math.exp %72 : vector<8x8xf32>
    %cst_25 = arith.constant dense<0.000000e+00> : vector<8xf32>
    %74 = vector.multi_reduction <add>, %73, %cst_25 [1] : vector<8x8xf32> to vector<8xf32>
    %75 = vector.shape_cast %74 : vector<8xf32> to vector<8x1xf32>
    %76 = tpu.reciprocal %75 {approx = true} : vector<8x1xf32> -> vector<8x1xf32>
    %77 = vector.broadcast %76 : vector<8x1xf32> to vector<8x8xf32>
    %78 = arith.mulf %73, %77 : vector<8x8xf32>
    %79 = arith.truncf %78 : vector<8x8xf32> to vector<8x8xbf16>
    %cst_26 = arith.constant dense<0.000000e+00> : vector<8x8xf32>
    %80 = tpu.matmul %79, %67, %cst_26 {dimension_numbers = #tpu.dot_dimension_numbers<[1], [0], [0], [1], [0, 0, 1, 1], [], []>} : vector<8x8xbf16>, vector<8x8xbf16>, vector<8x8xf32> -> vector<8x8xf32>
    %81 = vector.extract_strided_slice %32 {offsets = [0, 24], sizes = [8, 8], strides = [1, 1]} : vector<8x96xbf16> to vector<8x8xbf16>
    %82 = vector.extract_strided_slice %32 {offsets = [0, 56], sizes = [8, 8], strides = [1, 1]} : vector<8x96xbf16> to vector<8x8xbf16>
    %83 = vector.extract_strided_slice %32 {offsets = [0, 88], sizes = [8, 8], strides = [1, 1]} : vector<8x96xbf16> to vector<8x8xbf16>
    %cst_27 = arith.constant dense<0.000000e+00> : vector<8x8xf32>
    %84 = tpu.matmul %81, %82, %cst_27 {dimension_numbers = #tpu.dot_dimension_numbers<[1], [1], [0], [0], [0, 0, 1, 0], [], []>} : vector<8x8xbf16>, vector<8x8xbf16>, vector<8x8xf32> -> vector<8x8xf32>
    %cst_28 = arith.constant dense<0xFF800000> : vector<8xf32>
    %85 = vector.multi_reduction <maximumf>, %84, %cst_28 [1] : vector<8x8xf32> to vector<8xf32>
    %86 = vector.shape_cast %85 : vector<8xf32> to vector<8x1xf32>
    %87 = vector.broadcast %86 : vector<8x1xf32> to vector<8x8xf32>
    %88 = arith.subf %84, %87 : vector<8x8xf32>
    %89 = math.exp %88 : vector<8x8xf32>
    %cst_29 = arith.constant dense<0.000000e+00> : vector<8xf32>
    %90 = vector.multi_reduction <add>, %89, %cst_29 [1] : vector<8x8xf32> to vector<8xf32>
    %91 = vector.shape_cast %90 : vector<8xf32> to vector<8x1xf32>
    %92 = tpu.reciprocal %91 {approx = true} : vector<8x1xf32> -> vector<8x1xf32>
    %93 = vector.broadcast %92 : vector<8x1xf32> to vector<8x8xf32>
    %94 = arith.mulf %89, %93 : vector<8x8xf32>
    %95 = arith.truncf %94 : vector<8x8xf32> to vector<8x8xbf16>
    %cst_30 = arith.constant dense<0.000000e+00> : vector<8x8xf32>
    %96 = tpu.matmul %95, %83, %cst_30 {dimension_numbers = #tpu.dot_dimension_numbers<[1], [0], [0], [1], [0, 0, 1, 1], [], []>} : vector<8x8xbf16>, vector<8x8xbf16>, vector<8x8xf32> -> vector<8x8xf32>
    %97 = tpu.concatenate %48, %64, %80, %96 in 1 : vector<8x8xf32>, vector<8x8xf32>, vector<8x8xf32>, vector<8x8xf32> -> vector<8x32xf32>
    %98 = arith.truncf %97 : vector<8x32xf32> to vector<8x32xbf16>
    %c0_31 = arith.constant 0 : index
    %c0_32 = arith.constant 0 : index
    %99 = vector.load %arg6[%c0_31, %c0_32] : memref<32x32xbf16, #tpu.memory_space<vmem>>, vector<32x32xbf16>
    %cst_33 = arith.constant dense<0.000000e+00> : vector<8x32xf32>
    %100 = tpu.matmul %98, %99, %cst_33 {dimension_numbers = #tpu.dot_dimension_numbers<[1], [0], [0], [1], [0, 0, 1, 1], [], []>} : vector<8x32xbf16>, vector<32x32xbf16>, vector<8x32xf32> -> vector<8x32xf32>
    %c0_34 = arith.constant 0 : index
    %c0_35 = arith.constant 0 : index
    %101 = vector.load %arg7[%c0_34, %c0_35] : memref<1x32xf32, #tpu.memory_space<vmem>>, vector<1x32xf32>
    %102 = vector.broadcast %101 : vector<1x32xf32> to vector<8x32xf32>
    %103 = arith.addf %100, %102 : vector<8x32xf32>
    %104 = arith.addf %1, %103 : vector<8x32xf32>
    %c0_36 = arith.constant 0 : index
    %c0_37 = arith.constant 0 : index
    %105 = vector.load %arg8[%c0_36, %c0_37] : memref<1x32xf32, #tpu.memory_space<vmem>>, vector<1x32xf32>
    %c0_38 = arith.constant 0 : index
    %c0_39 = arith.constant 0 : index
    %106 = vector.load %arg9[%c0_38, %c0_39] : memref<1x32xf32, #tpu.memory_space<vmem>>, vector<1x32xf32>
    %cst_40 = arith.constant dense<0.000000e+00> : vector<8xf32>
    %107 = vector.multi_reduction <add>, %104, %cst_40 [1] : vector<8x32xf32> to vector<8xf32>
    %108 = vector.shape_cast %107 : vector<8xf32> to vector<8x1xf32>
    %cst_41 = arith.constant 3.200000e+01 : f32
    %109 = vector.broadcast %cst_41 : f32 to vector<8x1xf32>
    %110 = arith.divf %108, %109 : vector<8x1xf32>
    %111 = vector.broadcast %110 : vector<8x1xf32> to vector<8x32xf32>
    %112 = arith.subf %104, %111 : vector<8x32xf32>
    %113 = arith.mulf %112, %112 : vector<8x32xf32>
    %cst_42 = arith.constant dense<0.000000e+00> : vector<8xf32>
    %114 = vector.multi_reduction <add>, %113, %cst_42 [1] : vector<8x32xf32> to vector<8xf32>
    %115 = vector.shape_cast %114 : vector<8xf32> to vector<8x1xf32>
    %cst_43 = arith.constant 3.200000e+01 : f32
    %116 = vector.broadcast %cst_43 : f32 to vector<8x1xf32>
    %117 = arith.divf %115, %116 : vector<8x1xf32>
    %118 = vector.broadcast %110 : vector<8x1xf32> to vector<8x32xf32>
    %119 = arith.subf %104, %118 : vector<8x32xf32>
    %cst_44 = arith.constant 9.99999974E-6 : f32
    %120 = vector.broadcast %cst_44 : f32 to vector<8x1xf32>
    %121 = arith.addf %117, %120 : vector<8x1xf32>
    %122 = math.rsqrt %121 : vector<8x1xf32>
    %123 = vector.broadcast %122 : vector<8x1xf32> to vector<8x32xf32>
    %124 = arith.mulf %119, %123 : vector<8x32xf32>
    %125 = vector.broadcast %105 : vector<1x32xf32> to vector<8x32xf32>
    %126 = arith.mulf %124, %125 : vector<8x32xf32>
    %127 = vector.broadcast %106 : vector<1x32xf32> to vector<8x32xf32>
    %128 = arith.addf %126, %127 : vector<8x32xf32>
    %129 = arith.truncf %128 : vector<8x32xf32> to vector<8x32xbf16>
    %c0_45 = arith.constant 0 : index
    %c0_46 = arith.constant 0 : index
    %130 = vector.load %arg10[%c0_45, %c0_46] : memref<32x128xbf16, #tpu.memory_space<vmem>>, vector<32x128xbf16>
    %cst_47 = arith.constant dense<0.000000e+00> : vector<8x128xf32>
    %131 = tpu.matmul %129, %130, %cst_47 {dimension_numbers = #tpu.dot_dimension_numbers<[1], [0], [0], [1], [0, 0, 1, 1], [], []>} : vector<8x32xbf16>, vector<32x128xbf16>, vector<8x128xf32> -> vector<8x128xf32>
    %c0_48 = arith.constant 0 : index
    %c0_49 = arith.constant 0 : index
    %132 = vector.load %arg11[%c0_48, %c0_49] : memref<1x128xf32, #tpu.memory_space<vmem>>, vector<1x128xf32>
    %133 = vector.broadcast %132 : vector<1x128xf32> to vector<8x128xf32>
    %134 = arith.addf %131, %133 : vector<8x128xf32>
    %cst_50 = arith.constant 0.000000e+00 : f32
    %135 = vector.broadcast %cst_50 : f32 to vector<8x128xf32>
    %136 = arith.maximumf %134, %135 : vector<8x128xf32>
    %137 = arith.truncf %136 : vector<8x128xf32> to vector<8x128xbf16>
    %c0_51 = arith.constant 0 : index
    %c0_52 = arith.constant 0 : index
    %138 = vector.load %arg12[%c0_51, %c0_52] : memref<128x32xbf16, #tpu.memory_space<vmem>>, vector<128x32xbf16>
    %cst_53 = arith.constant dense<0.000000e+00> : vector<8x32xf32>
    %139 = tpu.matmul %137, %138, %cst_53 {dimension_numbers = #tpu.dot_dimension_numbers<[1], [0], [0], [1], [0, 0, 1, 1], [], []>} : vector<8x128xbf16>, vector<128x32xbf16>, vector<8x32xf32> -> vector<8x32xf32>
    %c0_54 = arith.constant 0 : index
    %c0_55 = arith.constant 0 : index
    %140 = vector.load %arg13[%c0_54, %c0_55] : memref<1x32xf32, #tpu.memory_space<vmem>>, vector<1x32xf32>
    %141 = vector.broadcast %140 : vector<1x32xf32> to vector<8x32xf32>
    %142 = arith.addf %139, %141 : vector<8x32xf32>
    %143 = arith.addf %104, %142 : vector<8x32xf32>
    %c0_56 = arith.constant 0 : index
    %c0_57 = arith.constant 0 : index
    %c0_58 = arith.constant 0 : index
    %144 = vector.load %arg14[%c0_56, %c0_57, %c0_58] : memref<1x8x32xf32, #tpu.memory_space<vmem>>, vector<1x8x32xf32>
    %145 = vector.shape_cast %144 : vector<1x8x32xf32> to vector<8x32xf32>
    %146 = vector.shape_cast %143 : vector<8x32xf32> to vector<1x8x32xf32>
    tpu.vector_store %arg14[%c0_56, %c0_57, %c0_58], %146 {strides = array<i32>} : memref<1x8x32xf32, #tpu.memory_space<vmem>>, vector<1x8x32xf32>,
    return
  }
  func.func @transform_0(%arg0: i32) -> (i32, i32, i32) {
    %c0_i32 = arith.constant 0 : i32
    %c0_i32_0 = arith.constant 0 : i32
    %c0_i32_1 = arith.constant 0 : i32
    return %arg0, %c0_i32, %c0_i32_0 : i32, i32, i32
  }
  func.func @transform_1(%arg0: i32) -> (i32, i32) {
    %c0_i32 = arith.constant 0 : i32
    %c0_i32_0 = arith.constant 0 : i32
    %c0_i32_1 = arith.constant 0 : i32
    return %c0_i32, %c0_i32_0 : i32, i32
  }
  func.func @transform_2(%arg0: i32) -> (i32, i32) {
    %c0_i32 = arith.constant 0 : i32
    %c0_i32_0 = arith.constant 0 : i32
    %c0_i32_1 = arith.constant 0 : i32
    return %c0_i32, %c0_i32_0 : i32, i32
  }
  func.func @transform_3(%arg0: i32) -> (i32, i32) {
    %c0_i32 = arith.constant 0 : i32
    %c0_i32_0 = arith.constant 0 : i32
    %c0_i32_1 = arith.constant 0 : i32
    return %c0_i32, %c0_i32_0 : i32, i32
  }
  func.func @transform_4(%arg0: i32) -> (i32, i32) {
    %c0_i32 = arith.constant 0 : i32
    %c0_i32_0 = arith.constant 0 : i32
    %c0_i32_1 = arith.constant 0 : i32
    return %c0_i32, %c0_i32_0 : i32, i32
  }
  func.func @transform_5(%arg0: i32) -> (i32, i32) {
    %c0_i32 = arith.constant 0 : i32
    %c0_i32_0 = arith.constant 0 : i32
    %c0_i32_1 = arith.constant 0 : i32
    return %c0_i32, %c0_i32_0 : i32, i32
  }
  func.func @transform_6(%arg0: i32) -> (i32, i32) {
    %c0_i32 = arith.constant 0 : i32
    %c0_i32_0 = arith.constant 0 : i32
    %c0_i32_1 = arith.constant 0 : i32
    return %c0_i32, %c0_i32_0 : i32, i32
  }
  func.func @transform_7(%arg0: i32) -> (i32, i32) {
    %c0_i32 = arith.constant 0 : i32
    %c0_i32_0 = arith.constant 0 : i32
    %c0_i32_1 = arith.constant 0 : i32
    return %c0_i32, %c0_i32_0 : i32, i32
  }
  func.func @transform_8(%arg0: i32) -> (i32, i32) {
    %c0_i32 = arith.constant 0 : i32
    %c0_i32_0 = arith.constant 0 : i32
    %c0_i32_1 = arith.constant 0 : i32
    return %c0_i32, %c0_i32_0 : i32, i32
  }
  func.func @transform_9(%arg0: i32) -> (i32, i32) {
    %c0_i32 = arith.constant 0 : i32
    %c0_i32_0 = arith.constant 0 : i32
    %c0_i32_1 = arith.constant 0 : i32
    return %c0_i32, %c0_i32_0 : i32, i32
  }
  func.func @transform_10(%arg0: i32) -> (i32, i32) {
    %c0_i32 = arith.constant 0 : i32
    %c0_i32_0 = arith.constant 0 : i32
    %c0_i32_1 = arith.constant 0 : i32
    return %c0_i32, %c0_i32_0 : i32, i32
  }
  func.func @transform_11(%arg0: i32) -> (i32, i32) {
    %c0_i32 = arith.constant 0 : i32
    %c0_i32_0 = arith.constant 0 : i32
    %c0_i32_1 = arith.constant 0 : i32
    return %c0_i32, %c0_i32_0 : i32, i32
  }
  func.func @transform_12(%arg0: i32) -> (i32, i32) {
    %c0_i32 = arith.constant 0 : i32
    %c0_i32_0 = arith.constant 0 : i32
    %c0_i32_1 = arith.constant 0 : i32
    return %c0_i32, %c0_i32_0 : i32, i32
  }
  func.func @transform_13(%arg0: i32) -> (i32, i32, i32) {
    %c0_i32 = arith.constant 0 : i32
    %c0_i32_0 = arith.constant 0 : i32
    %c0_i32_1 = arith.constant 0 : i32
    return %arg0, %c0_i32, %c0_i32_0 : i32, i32, i32
  }
}

</mosaic_0001>

<bundles_post_ra>
// kernel: tpu_custom_call.1
= control target key start
LH: loop header
LB: loop body
LE: loop exit
PB: predicated region body
PF: predicated region fallthrough
CT: control target
= control target key end

     0   :  { %s2022_s0 = inlined_call_operand.vmem [shape: f32[2,8,32], index: 0, kind: input, shape index: {}]   ;;  %s2023_s1 = inlined_call_operand.vmem [shape: f32[1,32], index: 1, kind: input, shape index: {}]   ;;  %s2024_s2 = inlined_call_operand.vmem [shape: f32[1,32], index: 2, kind: input, shape index: {}]   ;;  %s2025_s3 = inlined_call_operand.vmem [shape: bf16[32,96], index: 3, kind: input, shape index: {}]   ;;  %s2026_s4 = inlined_call_operand.vmem [shape: f32[1,96], index: 4, kind: input, shape index: {}]   ;;  %s2027_s5 = inlined_call_operand.vmem [shape: bf16[32,32], index: 5, kind: input, shape index: {}]   ;;  %s2028_s6 = inlined_call_operand.vmem [shape: f32[1,32], index: 6, kind: input, shape index: {}]   ;;  %s2029_s7 = inlined_call_operand.vmem [shape: f32[1,32], index: 7, kind: input, shape index: {}]   ;;  %s2030_s8 = inlined_call_operand.vmem [shape: f32[1,32], index: 8, kind: input, shape index: {}]   ;;  %s2031_s9 = inlined_call_operand.vmem [shape: bf16[32,128], index: 9, kind: input, shape index: {}]   ;;  %s2032_s10 = inlined_call_operand.vmem [shape: f32[1,128], index: 10, kind: input, shape index: {}]   ;;  %s2033_s11 = inlined_call_operand.vmem [shape: bf16[128,32], index: 11, kind: input, shape index: {}]   ;;  %s2034_s12 = inlined_call_operand.vmem [shape: f32[1,32], index: 12, kind: input, shape index: {}]   ;;  %s2035_s13 = inlined_call_operand.hbm [shape: f32[2,8,32], index: 13, kind: output, shape index: {}]  }
   0x1   :  { %2036 = sst [smem:[#allocation5_spill]] %s2022_s0 }
   0x2   :  { %2037 = sst [smem:[#allocation6_spill]] %s2023_s1 }
   0x3   :  { %2038 = sst [smem:[#allocation7_spill]] %s2024_s2 }
   0x4   :  { %18 = vsyncpa [#allocation3], 0 }
   0x5   :  { %20 = vsyncpa [#allocation3 + $0x1], 0  ;;  %s1754_s25 = smov 0   ;;  %s1756_s26 = smov 0  }
   0x6   :  { %s1758_s27 = smov 0   ;;  %s1760_s28 = smov 0  }
   0x7 LB: > { %s1775_s29 = sadd.s32 4294967295, %s1665_s28   ;;  %s1347_s30 = sadd.s32 4294967294, %s1665_s28   ;;  %s1665_s28 = sphi %s1760_s28, %s2047_s28   ;;  %s1661_s27 = sphi %s1758_s27, %s2046_s27   ;;  %s1657_s26 = sphi %s1756_s26, %s2045_s26   ;;  %s1653_s25 = sphi %s1754_s25, %s2044_s25  }
   0x8   : > { %s1779_s14 = sadd.s32 1, %s1665_s28   ;;  %s311_s15 = sadd.s32 1, %s1661_s27 }
   0x9   : > { %s308_s16 = ssub.s32 %s1665_s28, %s1779_s14  ;;  %p321_p0 = scmp.ne.s32.totalorder %s1661_s27, %s1657_s26 }
   0xa   : > { %p309_p1 = scmp.eq.s32.totalorder %s308_s16, 0  ;;  %p322_p2 = scmp.eq.s32.totalorder %s1775_s29, 1 }
   0xb   : > { %p327_p3 = scmp.ne.s32.totalorder %s1657_s26, %s1653_s25  ;;  %p328_p4 = scmp.eq.s32.totalorder %s1347_s30, 1 }
   0xc   : > { %s1790_s17 = scalar_select %p309_p1, %s1661_s27, %s311_s15  }
   0xd   : > { %p1792_p5 = por %p322_p2, %p321_p0  ;;  %p1796_p6 = por %p328_p4, %p327_p3 }
   0xe   : > { %p1350_p7 = scmp.ge.s32.totalorder %s1665_s28, 1  ;;  %p389_p8 = scmp.lt.s32.totalorder %s1665_s28, 3 }
  0x10   : > { %p390_p9 = pnand %p1350_p7, %p389_p8 }
  0x11   : > { %p432_p10 = scmp.lt.s32.totalorder (!%p390_p9), %s1775_s29, 1  ;;  %s2041_s0 = sld [smem:[#allocation5_spill]] (!%p390_p9) }
  0x12   : > { %393 = sbr.rel (%p390_p9) target bundleno = 2454 (0x996), region = 72  ;;  %s2042_s1 = sld [smem:[#allocation6_spill]] (!%p390_p9) }
  0x13   : > { %s2043_s2 = sld [smem:[#allocation7_spill]] (!%p390_p9)  ;;  %s1669_s16 = smov (!%p390_p9), 120  }
  0x14   : > { %s1672_s22 = smov (!%p390_p9), 80   ;;  %s1673_s23 = smov (!%p390_p9), 112  }
  0x15   : > { %s1675_s30 = smov (!%p390_p9), 104   ;;  %s1676_s15 = smov (!%p390_p9), 64  }
  0x17   : > { %s433_s20 = scalar_select %p432_p10, %s1775_s29, 1  ;;  %vm440_vm0 = vcmask 261120   ;;  %v1571_v7 = vld [vmem:[%s2025_s3 + $0x8] sm:$0xff]   ;;  %v1667_v8 = vmov 0.0   ;;  %vm1668_vm1 = vmmov 0   ;;  %v1572_v9 = vld [vmem:[%s2025_s3] sm:$0xff]  }
  0x18   : > { %1424 = vmatprep.subr.bf16.mxu0 %v1667_v8  ;;  %1428 = vmatprep.mubr.msk.bf16.mxu0 %vm1668_vm1, %v1667_v8  ;;  %v1353_v14 = vld [vmem:[%s2042_s1] ss:$0 sm:$0xff]  ;;  %vm540_vm2 = vcmask 64512   ;;  %vm604_vm3 = vcmask 1043456   ;;  %vm991_vm4 = vcmask 130048   ;;  %vm993_vm5 = vcmask 195584  }
  0x19   : > { %s1352_s21 = sshll.u32 %s433_s20, 3  ;;  %1425 = vmatpush3.bf16.msra.mxu0 %v1571_v7  ;;  %1444 = vmatprep.subr.bf16.mxu1 %v1667_v8  ;;  %v1354_v16 = vld [vmem:[%s2043_s2] ss:$0 sm:$0xff]  ;;  %s1670_s20 = smov 96  }
  0x1a   : > { %s435_s24 = scalar_lea.vmem %s2041_s0, %s1352_s21  ;;  %1426 = vmatprep.subr.bf16.mxu0 %v1667_v8  ;;  %1446 = vmatprep.mubr.msk.bf16.mxu1 %vm1668_vm1, %v1667_v8  ;;  %v1355_v20 = vld [vmem:[%s2026_s4] ss:$0 sm:$0xff]  ;;  %s1671_s21 = smov 88  }
  0x1b   : > { %v1807_v0 = vld [vmem:[%s435_s24] sm:$0xff]  ;;  %s1674_s24 = smov 72  }
  0x1c   : > { %v441_v1 = vsel %vm440_vm0, %v1807_v0, 0.0 }
  0x1d   : > { %442 = vadd.xlane.f32.xlu0 %v441_v1  ;;  %1427 = vmatpush3.bf16.msra.mxu0 %v1572_v9 }
  0x1e   : > { %1432 = vmatprep.subr.bf16.mxu0 %v1667_v8 }
  0xa6   : > { %v443_v2 = vpop.xlane.xlu0 %442 }
  0xa7   : > { %v445_v3 = vmul.f32 0.03125, %v443_v2 }
  0xa9   : > { %v446_v4 = vsub.f32 %v1807_v0, %v445_v3 }
  0xab   : > { %v447_v5 = vmul.f32 %v446_v4, %v446_v4 }
  0xad   : > { %v448_v6 = vsel %vm440_vm0, %v447_v5, 0.0 }
  0xae   : > { %449 = vadd.xlane.f32.xlu0 %v448_v6 }
 0x137   : > { %v450_v10 = vpop.xlane.xlu0 %449 }
 0x138   : > { %v451_v11 = vmul.f32 0.03125, %v450_v10 }
 0x13a   : > { %v452_v12 = vadd.f32 1e-05, %v451_v11 }
 0x13c   : > { %1585 = vrsqrt.f32 %v452_v12 }
 0x149   : > { %v1586_v13 = vpop.eup %1585 }
 0x14a   : > { %v454_v15 = vmul.f32 %v1586_v13, %v446_v4 }
 0x14c   : > { %v461_v17 = vmul.f32 %v1353_v14, %v454_v15 }
 0x14e   : > { %v468_v18 = vadd.f32 %v1354_v16, %v461_v17 }
 0x150   : > { %v469_v19 = vpack.c.bf16 %v468_v18, %v468_v18 }
 0x152   : > { %1429 = vmatmul.mubr.msk.bf16.vlgmr.msra.gmra.mxu0 %vm440_vm0, %v469_v19 }
 0x153   : > { %1434 = vmatprep.mubr.msk.bf16.mxu0 %vm1668_vm1, %v1667_v8 }
 0x212   : > { %v530_v21 = vpop.f32.mrf.mxu0 }
 0x213   : > { %v531_v22 = vadd.f32 %v1355_v20, %v530_v21 }
 0x214   : > { %v1430_v23 = vpop.f32.mrf.mxu0 }
 0x215   : > { %v1839_v24 = vpack.c.bf16 %v531_v22, %v531_v22 }
 0x216   : > { %v533_v25 = vpop.f32.mrf.mxu0 }
 0x217   : > { %648 = vrot.lane.b32.xlu0 %v1839_v24, %s1669_s16  ;;  %538 = vrot.lane.b32.xlu1 %v1839_v24, %s1670_s20  ;;  %s1677_s16 = smov 56   ;;  %s1678_s20 = smov 48  }
 0x218   : > { %v1431_v26 = vpop.f32.mrf.mxu0 }
 0x21b   : > { %650 = vrot.lane.b32.xlu1 %v1839_v24, %s1671_s21  ;;  %s1679_s21 = smov 40  }
 0x21f   : > { %760 = vrot.lane.b32.xlu1 %v1839_v24, %s1672_s22  ;;  %s1680_s22 = smov 8  }
 0x223   : > { %758 = vrot.lane.b32.xlu1 %v1839_v24, %s1673_s23 }
 0x227   : > { %870 = vrot.lane.b32.xlu1 %v1839_v24, %s1674_s24 }
 0x22b   : > { %868 = vrot.lane.b32.xlu1 %v1839_v24, %s1675_s30  ;;  %s429_s30 = sand.u32 1, %s1657_s26  }
 0x289   : > { %v539_v27 = vpop.permute.xlu1 %538  ;;  %v649_v32 = vpop.permute.xlu0 %648 }
 0x28a   : > { %v545_v28 = vsel %vm540_vm2, %v539_v27, 0 }
 0x28b   : > { %1433 = vmatpush3.bf16.xpose.msra.mxu0 %v545_v28 }
 0x28c   : > { %1438 = vmatprep.subr.bf16.mxu0 %v1667_v8 }
 0x28d   : > { %v651_v29 = vpop.permute.xlu1 %650 }
 0x28e   : > { %v656_v30 = vsel %vm540_vm2, %v651_v29, 0 }
 0x28f   : > { %1445 = vmatpush3.bf16.xpose.msra.mxu1 %v656_v30 }
 0x290   : > { %1456 = vmatprep.subr.bf16.mxu1 %v1667_v8 }
 0x291   : > { %v761_v31 = vpop.permute.xlu1 %760 }
 0x292   : > { %1435 = vmatmul.mubr.msk.bf16.vlgmr.msra.gmra.mxu0 %vm540_vm2, %v1839_v24  ;;  %v766_v34 = vsel %vm540_vm2, %v761_v31, 0 }
 0x293   : > { %1440 = vmatprep.mubr.msk.bf16.mxu0 %vm1668_vm1, %v1667_v8 }
 0x295   : > { %v759_v33 = vpop.permute.xlu1 %758 }
 0x296   : > { %1447 = vmatmul.mubr.msk.bf16.vlgmr.msra.gmra.mxu1 %vm540_vm2, %v649_v32 }
 0x297   : > { %1457 = vmatpush3.bf16.xpose.msra.mxu1 %v766_v34  ;;  %1458 = vmatprep.mubr.msk.bf16.mxu1 %vm1668_vm1, %v1667_v8 }
 0x298   : > { %1468 = vmatprep.subr.bf16.mxu1 %v1667_v8 }
 0x299   : > { %v871_v35 = vpop.permute.xlu1 %870 }
 0x29a   : > { %v876_v36 = vsel %vm540_vm2, %v871_v35, 0 }
 0x29d   : > { %v869_v37 = vpop.permute.xlu1 %868 }
 0x29e   : > { %1459 = vmatmul.mubr.msk.bf16.vlgmr.msra.gmra.mxu1 %vm540_vm2, %v759_v33 }
 0x29f   : > { %1469 = vmatpush3.bf16.xpose.msra.mxu1 %v876_v36  ;;  %1470 = vmatprep.mubr.msk.bf16.mxu1 %vm1668_vm1, %v1667_v8 }
 0x2a0   : > { %1480 = vmatprep.subr.bf16.mxu1 %v1667_v8 }
 0x2a6   : > { %1471 = vmatmul.mubr.msk.bf16.vlgmr.msra.gmra.mxu1 %vm540_vm2, %v869_v37 }
 0x2a7   : > { %1484 = vmatprep.mubr.msk.bf16.mxu1 %vm1668_vm1, %v1667_v8 }
 0x352   : > { %v581_v38 = vpop.f32.mrf.mxu0 }
 0x353   : > { %v587_v39 = vsel %vm540_vm2, %v581_v38, -inf }
 0x354   : > { %588 = vmax.xlane.f32.xlu1 %v587_v39  ;;  %v1436_v40 = vpop.f32.mrf.mxu0 }
 0x356   : > { %v584_v41 = vpop.f32.mrf.mxu0  ;;  %v692_v42 = vpop.f32.mrf.mxu1 }
 0x357   : > { %v698_v43 = vsel %vm540_vm2, %v692_v42, -inf }
 0x358   : > { %699 = vmax.xlane.f32.xlu0 %v698_v43  ;;  %v1437_v44 = vpop.f32.mrf.mxu0  ;;  %v1448_v45 = vpop.f32.mrf.mxu1 }
 0x35a   : > { %v695_v46 = vpop.f32.mrf.mxu1 }
 0x35c   : > { %v1449_v47 = vpop.f32.mrf.mxu1 }
 0x35e   : > { %v802_v48 = vpop.f32.mrf.mxu1 }
 0x35f   : > { %v808_v49 = vsel %vm540_vm2, %v802_v48, -inf }
 0x360   : > { %v1460_v50 = vpop.f32.mrf.mxu1  ;;  %809 = vmax.xlane.f32.xlu1 %v808_v49  ;;  %v1574_v49 = vld [vmem:[%s2027_s5] sm:$0xff]  }
 0x362   : > { %v805_v51 = vpop.f32.mrf.mxu1 }
 0x364   : > { %v1461_v52 = vpop.f32.mrf.mxu1 }
 0x366   : > { %v912_v53 = vpop.f32.mrf.mxu1 }
 0x367   : > { %v918_v54 = vsel %vm540_vm2, %v912_v53, -inf }
 0x368   : > { %919 = vmax.xlane.f32.xlu0 %v918_v54  ;;  %v1472_v55 = vpop.f32.mrf.mxu1 }
 0x36a   : > { %v915_v56 = vpop.f32.mrf.mxu1 }
 0x36c   : > { %v1473_v57 = vpop.f32.mrf.mxu1 }
 0x3dd   : > { %v589_v58 = vpop.xlane.xlu1 %588 }
 0x3de   : > { %v590_v59 = vsub.f32 %v581_v38, %v589_v58 }
 0x3e0   : > { %v591_v60 = vmul.f32 1.442695, %v590_v59 }
 0x3e1   : > { %v700_v61 = vpop.xlane.xlu0 %699 }
 0x3e2   : > { %1587 = vpow2.f32 %v591_v60  ;;  %v701_v62 = vsub.f32 %v692_v42, %v700_v61 }
 0x3e4   : > { %v702_v63 = vmul.f32 1.442695, %v701_v62 }
 0x3e6   : > { %1589 = vpow2.f32 %v702_v63 }
 0x3e9   : > { %v810_v11 = vpop.xlane.xlu1 %809 }
 0x3ea   : > { %v811_v12 = vsub.f32 %v802_v48, %v810_v11  ;;  %v1573_v48 = vld [vmem:[%s2027_s5 + $0x8] sm:$0xff]  }
 0x3eb   : > { %1481 = vmatpush3.bf16.msra.mxu1 %v1573_v48 }
 0x3ec   : > { %v812_v13 = vmul.f32 1.442695, %v811_v12  ;;  %1482 = vmatprep.subr.bf16.mxu1 %v1667_v8 }
 0x3ef   : > { %v1588_v1 = vpop.eup %1587  ;;  %1483 = vmatpush3.bf16.msra.mxu1 %v1574_v49 }
 0x3f0   : > { %v593_v2 = vsel %vm540_vm2, %v1588_v1, 0.0  ;;  %1496 = vmatprep.subr.bf16.mxu1 %v1667_v8 }
 0x3f1   : > { %v920_v3 = vpop.xlane.xlu0 %919  ;;  %594 = vadd.xlane.f32.xlu1 %v593_v2  ;;  %v1367_v2 = vld [vmem:[%s2028_s6] ss:$0 sm:$0xff] }
 0x3f2   : > { %v921_v4 = vsub.f32 %v912_v53, %v920_v3 }
 0x3f3   : > { %v1590_v5 = vpop.eup %1589 }
 0x3f4   : > { %v922_v6 = vmul.f32 1.442695, %v921_v4  ;;  %v704_v7 = vsel %vm540_vm2, %v1590_v5, 0.0 }
 0x3f5   : > { %705 = vadd.xlane.f32.xlu0 %v704_v7 }
 0x3f6   : > { %1591 = vpow2.f32 %v922_v6 }
 0x3f7   : > { %1593 = vpow2.f32 %v812_v13 }
 0x402   : > { %599 = vrot.lane.b32.xlu1 %v1839_v24, %s1676_s15  ;;  %s1351_s15 = sshll.u32 %s429_s30, 3 }
 0x403   : > { %v1592_v9 = vpop.eup %1591 }
 0x404   : > { %v924_v10 = vsel %vm540_vm2, %v1592_v9, 0.0  ;;  %v1594_v14 = vpop.eup %1593 }
 0x405   : > { %925 = vadd.xlane.f32.xlu0 %v924_v10  ;;  %v814_v15 = vsel %vm540_vm2, %v1594_v14, 0.0 }
 0x41b   : > { %710 = vrot.lane.b32.xlu0 %v1839_v24, %s1677_s16  ;;  %s1681_s16 = smov 16  }
 0x426   : > { %815 = vadd.xlane.f32.xlu1 %v814_v15 }
 0x437   : > { %820 = vrot.lane.b32.xlu1 %v1839_v24, %s1678_s20  ;;  %s1682_s20 = smov 24  }
 0x43b   : > { %930 = vrot.lane.b32.xlu1 %v1839_v24, %s1679_s21  ;;  %s1387_s21 = sshll.u32 %s1775_s29, 7  ;;  %s1275_s29 = scalar_lea.sflag [#allocation3], %s429_s30 }
 0x43c   : > { %s1980_s1 = scalar_lea.hbm %s2035_s13, %s1387_s21 }
 0x47a   : > { %v595_v16 = vpop.xlane.xlu1 %594 }
 0x47b   : > { %1595 = vrcp.f32 %v595_v16  ;;  %v1575_v16 = vld [vmem:[%s2031_s9 + $0x8] sm:$0xff]  }
 0x47e   : > { %v706_v17 = vpop.xlane.xlu0 %705  ;;  %v600_v18 = vpop.permute.xlu1 %599 }
 0x47f   : > { %v606_v19 = vsel %vm604_vm3, %v600_v18, 0  ;;  %1597 = vrcp.f32 %v706_v17  ;;  %v1577_v17 = vld [vmem:[%s2033_s11 + $0x38] sm:$0xff]   ;;  %v1578_v18 = vld [vmem:[%s2033_s11 + $0x30] sm:$0xff]  }
 0x480   : > { %1439 = vmatpush3.bf16.msra.mxu0 %v606_v19  ;;  %v1579_v19 = vld [vmem:[%s2033_s11 + $0x28] sm:$0xff]  }
 0x481   : > { %1450 = vmatprep.subr.bf16.mxu0 %v1667_v8 }
 0x488   : > { %v1596_v20 = vpop.eup %1595 }
 0x489   : > { %v597_v21 = vmul.f32 %v1596_v20, %v1588_v1  ;;  %v1580_v20 = vld [vmem:[%s2033_s11 + $0x20] sm:$0xff]  }
 0x48b   : > { %v598_v22 = vpack.c.bf16 %v597_v21, %v597_v21  ;;  %v1581_v21 = vld [vmem:[%s2033_s11 + $0x18] sm:$0xff]  }
 0x48c   : > { %v1598_v23 = vpop.eup %1597 }
 0x48d   : > { %1441 = vmatmul.mubr.msk.bf16.vlgmr.msra.gmra.mxu0 %vm540_vm2, %v598_v22  ;;  %v708_v24 = vmul.f32 %v1598_v23, %v1590_v5  ;;  %v1582_v22 = vld [vmem:[%s2033_s11 + $0x10] sm:$0xff]  }
 0x48e   : > { %v926_v25 = vpop.xlane.xlu0 %925  ;;  %1452 = vmatprep.mubr.msk.bf16.mxu0 %vm1668_vm1, %v1667_v8 }
 0x48f   : > { %v709_v28 = vpack.c.bf16 %v708_v24, %v708_v24 }
 0x492   : > { %v711_v26 = vpop.permute.xlu0 %710 }
 0x493   : > { %v716_v27 = vsel %vm604_vm3, %v711_v26, 0 }
 0x494   : > { %1451 = vmatpush3.bf16.msra.mxu0 %v716_v27  ;;  %v1371_v27 = vld [vmem:[%s2029_s7] ss:$0 sm:$0xff] }
 0x495   : > { %1462 = vmatprep.subr.bf16.mxu0 %v1667_v8 }
 0x497   : > { %1453 = vmatmul.mubr.msk.bf16.vlgmr.msra.gmra.mxu0 %vm540_vm2, %v709_v28 }
 0x498   : > { %1464 = vmatprep.mubr.msk.bf16.mxu0 %vm1668_vm1, %v1667_v8 }
 0x4af   : > { %v816_v29 = vpop.xlane.xlu1 %815 }
 0x4b0   : > { %1599 = vrcp.f32 %v816_v29  ;;  %v1372_v29 = vld [vmem:[%s2030_s8] ss:$0 sm:$0xff] }
 0x4b1   : > { %1601 = vrcp.f32 %v926_v25 }
 0x4b3   : > { %v821_v30 = vpop.permute.xlu1 %820 }
 0x4b4   : > { %v826_v31 = vsel %vm604_vm3, %v821_v30, 0 }
 0x4b5   : > { %1463 = vmatpush3.bf16.msra.mxu0 %v826_v31 }
 0x4b6   : > { %1474 = vmatprep.subr.bf16.mxu0 %v1667_v8 }
 0x4b7   : > { %v931_v34 = vpop.permute.xlu1 %930 }
 0x4b8   : > { %v936_v37 = vsel %vm604_vm3, %v931_v34, 0  ;;  %v1584_v34 = vld [vmem:[%s2033_s11] sm:$0xff]  }
 0x4bd   : > { %v1600_v32 = vpop.eup %1599 }
 0x4be   : > { %v818_v33 = vmul.f32 %v1600_v32, %v1594_v14  ;;  %v1602_v36 = vpop.eup %1601 }
 0x4bf   : > { %v928_v38 = vmul.f32 %v1602_v36, %v1592_v9 }
 0x4c0   : > { %v819_v35 = vpack.c.bf16 %v818_v33, %v818_v33  ;;  %v1583_v33 = vld [vmem:[%s2033_s11 + $0x8] sm:$0xff]  }
 0x4c1   : > { %v929_v39 = vpack.c.bf16 %v928_v38, %v928_v38 }
 0x4c2   : > { %1465 = vmatmul.mubr.msk.bf16.vlgmr.msra.gmra.mxu0 %vm540_vm2, %v819_v35  ;;  %v1373_v35 = vld [vmem:[%s2032_s10] ss:$0 sm:$0xff] }
 0x4c3   : > { %1475 = vmatpush3.bf16.msra.mxu0 %v936_v37  ;;  %1476 = vmatprep.mubr.msk.bf16.mxu0 %vm1668_vm1, %v1667_v8 }
 0x4c4   : > { %1488 = vmatprep.subr.bf16.mxu0 %v1667_v8 }
 0x4ca   : > { %1477 = vmatmul.mubr.msk.bf16.vlgmr.msra.gmra.mxu0 %vm540_vm2, %v929_v39 }
 0x4cb   : > { %1492 = vmatprep.mubr.msk.bf16.mxu0 %vm1668_vm1, %v1667_v8  ;;  %1489 = vmatpush3.bf16.msra.mxu0 %v1575_v16 }
 0x4cc   : > { %1490 = vmatprep.subr.bf16.mxu0 %v1667_v8 }
 0x54d   : > { %v642_v40 = vpop.f32.mrf.mxu0 }
 0x54f   : > { %v1442_v41 = vpop.f32.mrf.mxu0 }
 0x551   : > { %v645_v42 = vpop.f32.mrf.mxu0 }
 0x553   : > { %v1443_v43 = vpop.f32.mrf.mxu0 }
 0x557   : > { %v752_v44 = vpop.f32.mrf.mxu0 }
 0x558   : > { %979 = vrot.lane.b32.xlu0 %v752_v44, %s1680_s22  ;;  %s431_s22 = scalar_lea.vmem [#allocation2], %s1351_s15 }
 0x559   : > { %v1454_v45 = vpop.f32.mrf.mxu0  ;;  %s1288_s23 = sshll.u32 %s431_s22, 4  ;;  %s1982_s23 = int_to_ptr.vmem [resolvable:$true] %s1288_s23 }
 0x55a   : > { %s1605_s15 = scalar_lea.vmem %s1982_s23, 128 }
 0x55b   : > { %v755_v46 = vpop.f32.mrf.mxu0  ;;  %p1606_p11 = scmp.ne.s32.totalorder %s1982_s23, %s1605_s15 }
 0x55d   : > { %v1455_v47 = vpop.f32.mrf.mxu0  ;;  %p1607_p12 = pnand %p1606_p11, %p1792_p5 }
 0x55f   : > { %p1608_p13 = pneg %p1607_p12 }
 0x582   : > { %v862_v50 = vpop.f32.mrf.mxu0 }
 0x583   : > { %983 = vrot.lane.b32.xlu1 %v862_v50, %s1681_s16  ;;  %s1683_s16 = smov [#allocation2]  }
 0x584   : > { %v1466_v51 = vpop.f32.mrf.mxu0 }
 0x586   : > { %v865_v52 = vpop.f32.mrf.mxu0 }
 0x588   : > { %v1467_v53 = vpop.f32.mrf.mxu0 }
 0x58a   : > { %v972_v54 = vpop.f32.mrf.mxu0 }
 0x58b   : > { %987 = vrot.lane.b32.xlu0 %v972_v54, %s1682_s20  ;;  %s1609_s20 = sshll.u32 %s1683_s16, 4  ;;  %s1610_s20 = int_to_ptr.vmem [resolvable:$false] %s1609_s20 }
 0x58c   : > { %v1478_v55 = vpop.f32.mrf.mxu0  ;;  %s1611_s0 = scalar_lea.vmem %s1610_s20, 256  ;;  %p1612_p0 = scmp.lt.s32.totalorder %s1982_s23, %s1610_s20 }
 0x58d   : > { %p1613_p1 = scmp.lt.s32.totalorder %s1611_s0, %s1605_s15 }
 0x58e   : > { %v975_v56 = vpop.f32.mrf.mxu0 }
 0x58f   : > { %p1614_p2 = por %p1613_p1, %p1612_p0 }
 0x590   : > { %v1479_v57 = vpop.f32.mrf.mxu0 }
 0x591   : > { %p1615_p3 = pnand %p1614_p2, %p1608_p13 }
 0x5ca   : > { %v980_v58 = vpop.permute.xlu0 %979 }
 0x5cb   : > { %v990_v60 = vsel %vm540_vm2, %v642_v40, %v980_v58 }
 0x5f5   : > { %v984_v59 = vpop.permute.xlu1 %983 }
 0x5f6   : > { %v992_v61 = vsel %vm991_vm4, %v990_v60, %v984_v59 }
 0x5fd   : > { %v988_v62 = vpop.permute.xlu0 %987 }
 0x5fe   : > { %v994_v63 = vsel %vm993_vm5, %v992_v61, %v988_v62 }
 0x5ff   : > { %v995_v1 = vpack.c.bf16 %v994_v63, %v994_v63 }
 0x601   : > { %1485 = vmatmul.mubr.msk.bf16.vlgmr.msra.gmra.mxu1 %vm440_vm0, %v995_v1 }
 0x602   : > { %1512 = vmatprep.mubr.msk.bf16.mxu1 %vm1668_vm1, %v1667_v8  ;;  %1497 = vmatpush3.bf16.msra.mxu1 %v1577_v17 }
 0x603   : > { %1498 = vmatprep.subr.bf16.mxu1 %v1667_v8 }
 0x606   : > { %1499 = vmatpush3.bf16.msra.mxu1 %v1578_v18 }
 0x607   : > { %1500 = vmatprep.subr.bf16.mxu1 %v1667_v8 }
 0x60a   : > { %1501 = vmatpush3.bf16.msra.mxu1 %v1579_v19 }
 0x60b   : > { %1502 = vmatprep.subr.bf16.mxu1 %v1667_v8 }
 0x60e   : > { %1503 = vmatpush3.bf16.msra.mxu1 %v1580_v20 }
 0x60f   : > { %1504 = vmatprep.subr.bf16.mxu1 %v1667_v8 }
 0x612   : > { %1505 = vmatpush3.bf16.msra.mxu1 %v1581_v21 }
 0x613   : > { %1506 = vmatprep.subr.bf16.mxu1 %v1667_v8 }
 0x616   : > { %1507 = vmatpush3.bf16.msra.mxu1 %v1582_v22 }
 0x617   : > { %1508 = vmatprep.subr.bf16.mxu1 %v1667_v8 }
 0x61a   : > { %1509 = vmatpush3.bf16.msra.mxu1 %v1583_v33 }
 0x61b   : > { %1510 = vmatprep.subr.bf16.mxu1 %v1667_v8  ;;  %v1377_v8 = vld [vmem:[%s2034_s12] ss:$0 sm:$0xff] }
 0x61e   : > { %1511 = vmatpush3.bf16.msra.mxu1 %v1584_v34 }
 0x6c1   : > { %v1056_v3 = vpop.f32.mrf.mxu1 }
 0x6c2   : > { %v1057_v4 = vadd.f32 %v1367_v2, %v1056_v3 }
 0x6c3   : > { %v1486_v5 = vpop.f32.mrf.mxu1 }
 0x6c4   : > { %v1917_v6 = vadd.f32 %v1057_v4, %v1807_v0  ;;  %v1576_v0 = vld [vmem:[%s2031_s9] sm:$0xff]  }
 0x6c5   : > { %v1059_v7 = vpop.f32.mrf.mxu1  ;;  %1491 = vmatpush3.bf16.msra.mxu0 %v1576_v0 }
 0x6c6   : > { %v1065_v9 = vsel %vm440_vm0, %v1917_v6, 0.0 }
 0x6c7   : > { %1066 = vadd.xlane.f32.xlu1 %v1065_v9  ;;  %v1487_v10 = vpop.f32.mrf.mxu1 }
 0x750   : > { %v1067_v11 = vpop.xlane.xlu1 %1066 }
 0x751   : > { %v1068_v12 = vmul.f32 0.03125, %v1067_v11 }
 0x753   : > { %v1069_v13 = vsub.f32 %v1917_v6, %v1068_v12 }
 0x755   : > { %v1070_v14 = vmul.f32 %v1069_v13, %v1069_v13 }
 0x757   : > { %v1071_v15 = vsel %vm440_vm0, %v1070_v14, 0.0 }
 0x758   : > { %1072 = vadd.xlane.f32.xlu0 %v1071_v15 }
 0x7e1   : > { %v1073_v23 = vpop.xlane.xlu0 %1072 }
 0x7e2   : > { %v1074_v25 = vmul.f32 0.03125, %v1073_v23 }
 0x7e4   : > { %v1075_v24 = vadd.f32 1e-05, %v1074_v25 }
 0x7e6   : > { %1603 = vrsqrt.f32 %v1075_v24 }
 0x7f3   : > { %v1604_v26 = vpop.eup %1603 }
 0x7f4   : > { %v1077_v28 = vmul.f32 %v1604_v26, %v1069_v13 }
 0x7f6   : > { %v1084_v30 = vmul.f32 %v1371_v27, %v1077_v28 }
 0x7f8   : > { %v1091_v31 = vadd.f32 %v1372_v29, %v1084_v30 }
 0x7fa   : > { %v1092_v32 = vpack.c.bf16 %v1091_v31, %v1091_v31 }
 0x7fc   : > { %1493 = vmatmul.mubr.msk.bf16.vlgmr.msra.gmra.mxu0 %vm440_vm0, %v1092_v32 }
 0x8bc   : > { %v1153_v36 = vpop.f32.mrf.mxu0 }
 0x8bd   : > { %v1154_v37 = vadd.f32 %v1373_v35, %v1153_v36 }
 0x8be   : > { %v1494_v38 = vpop.f32.mrf.mxu0 }
 0x8bf   : > { %v1159_v39 = vmax.f32 %v1154_v37, 0.0 }
 0x8c0   : > { %v1156_v40 = vpop.f32.mrf.mxu0 }
 0x8c1   : > { %v1160_v41 = vpack.c.bf16 %v1159_v39, %v1159_v39 }
 0x8c2   : > { %v1495_v42 = vpop.f32.mrf.mxu0 }
 0x8c3   : > { %1513 = vmatmul.mubr.bf16.vlgmr.msra.gmra.mxu1 %v1160_v41 }
 0x983   : > { %v1266_v43 = vpop.f32.mrf.mxu1 }
 0x984   : > { %v1267_v44 = vadd.f32 %v1377_v8, %v1266_v43 }
 0x985   : > { %v1514_v45 = vpop.f32.mrf.mxu1 }
 0x986   : > { %v1272_v46 = vadd.f32 %v1267_v44, %v1917_v6 }
 0x987   : > { %v1269_v47 = vpop.f32.mrf.mxu1 }
 0x988   : > { %1273 = vst.msk [vmem:[%s431_s22] sm:$0xff] %vm440_vm0, %v1272_v46 }
 0x989   : > { %v1515_v48 = vpop.f32.mrf.mxu1 }
 0x98a   : > { %1618 = shalt.err (!%p1615_p3)
}
 0x98b   : > { %s1619_s21 = scalar_lea.hbm %s1980_s1, 128  ;;  %s1623_s24 = scalar_lea.hbm %s2035_s13, 256 }
 0x98c   : > { %p1620_p4 = scmp.ne.s32.totalorder %s1980_s1, %s1619_s21  ;;  %p1624_p9 = scmp.lt.s32.totalorder %s1980_s1, %s2035_s13 }
 0x98d   : > { %p1625_p10 = scmp.lt.s32.totalorder %s1623_s24, %s1619_s21 }
 0x98e   : > { %p1621_p7 = pnand %p1620_p4, %p1792_p5 }
 0x98f   : > { %p1626_p11 = por %p1625_p10, %p1624_p9 }
 0x990   : > { %p1622_p8 = pneg %p1621_p7 }
 0x992   : > { %p1627_p12 = pnand %p1626_p11, %p1622_p8 }
 0x994   : > { %1630 = shalt.err (!%p1627_p12)
}
 0x995   : > { %1516 = dma.vmem_to_hbm [thread:$0]  (%p1792_p5), %s1982_s23, 128, %s1980_s1, %s1275_s29  }
 0x996 PF: > { %p1522_p13 = scmp.ge.s32.totalorder %s1665_s28, 2  ;;  %s1300_s15 = sand.u32 1, %s1653_s25  }
 0x997   : > { %s1301_s2 = scalar_lea.sflag [#allocation3], %s1300_s15 }
 0x998   : > { %p1519_p0 = pnand %p1522_p13, %p1796_p6 }
 0x99a   : > { %p1520_p1 = pneg %p1519_p0 }
 0x99c   : > { %1648 = dma.done.wait (%p1520_p1), %s1301_s2, 128  }
 0x99d   : > { %1650 = vsyncadd (%p1520_p1), %s1301_s2, 4294967168  ;;  %p23_p2 = scmp.ge.s32.totalorder %s1779_s14, 4   ;;  %s2044_s25 = smov %s1657_s26 }
 0x99e   : > { %s2045_s26 = smov %s1661_s27  ;;  %s2046_s27 = smov %s1790_s17 }
 0x99f   : > { %s2047_s28 = smov %s1779_s14  ;;  %25 = sbr.rel (!%p23_p2) target bundleno = 7 (0x7), region = 107 }
 0x9a4   :  { %1306 = vsyncpa [#allocation3], 1 }
 0x9a5   :  { %1308 = vsyncpa [#allocation3 + $0x1], 1 }

// kernel: tpu_custom_call.1
= control target key start
LH: loop header
LB: loop body
LE: loop exit
PB: predicated region body
PF: predicated region fallthrough
CT: control target
= control target key end

     0   :  { %s2022_s0 = inlined_call_operand.vmem [shape: f32[2,8,32], index: 0, kind: input, shape index: {}]   ;;  %s2023_s1 = inlined_call_operand.vmem [shape: f32[1,32], index: 1, kind: input, shape index: {}]   ;;  %s2024_s2 = inlined_call_operand.vmem [shape: f32[1,32], index: 2, kind: input, shape index: {}]   ;;  %s2025_s3 = inlined_call_operand.vmem [shape: bf16[32,96], index: 3, kind: input, shape index: {}]   ;;  %s2026_s4 = inlined_call_operand.vmem [shape: f32[1,96], index: 4, kind: input, shape index: {}]   ;;  %s2027_s5 = inlined_call_operand.vmem [shape: bf16[32,32], index: 5, kind: input, shape index: {}]   ;;  %s2028_s6 = inlined_call_operand.vmem [shape: f32[1,32], index: 6, kind: input, shape index: {}]   ;;  %s2029_s7 = inlined_call_operand.vmem [shape: f32[1,32], index: 7, kind: input, shape index: {}]   ;;  %s2030_s8 = inlined_call_operand.vmem [shape: f32[1,32], index: 8, kind: input, shape index: {}]   ;;  %s2031_s9 = inlined_call_operand.vmem [shape: bf16[32,128], index: 9, kind: input, shape index: {}]   ;;  %s2032_s10 = inlined_call_operand.vmem [shape: f32[1,128], index: 10, kind: input, shape index: {}]   ;;  %s2033_s11 = inlined_call_operand.vmem [shape: bf16[128,32], index: 11, kind: input, shape index: {}]   ;;  %s2034_s12 = inlined_call_operand.vmem [shape: f32[1,32], index: 12, kind: input, shape index: {}]   ;;  %s2035_s13 = inlined_call_operand.hbm [shape: f32[2,8,32], index: 13, kind: output, shape index: {}]  }
   0x1   :  { %2036 = sst [smem:[#allocation5_spill]] %s2022_s0 }
   0x2   :  { %2037 = sst [smem:[#allocation6_spill]] %s2023_s1 }
   0x3   :  { %2038 = sst [smem:[#allocation7_spill]] %s2024_s2 }
   0x4   :  { %18 = vsyncpa [#allocation3], 0 }
   0x5   :  { %20 = vsyncpa [#allocation3 + $0x1], 0  ;;  %s1754_s25 = smov 0   ;;  %s1756_s26 = smov 0  }
   0x6   :  { %s1758_s27 = smov 0   ;;  %s1760_s28 = smov 0  }
   0x7 LB: > { %s1775_s29 = sadd.s32 4294967295, %s1665_s28   ;;  %s1347_s30 = sadd.s32 4294967294, %s1665_s28   ;;  %s1665_s28 = sphi %s1760_s28, %s2047_s28   ;;  %s1661_s27 = sphi %s1758_s27, %s2046_s27   ;;  %s1657_s26 = sphi %s1756_s26, %s2045_s26   ;;  %s1653_s25 = sphi %s1754_s25, %s2044_s25  }
   0x8   : > { %s1779_s14 = sadd.s32 1, %s1665_s28   ;;  %s311_s15 = sadd.s32 1, %s1661_s27 }
   0x9   : > { %s308_s16 = ssub.s32 %s1665_s28, %s1779_s14  ;;  %p321_p0 = scmp.ne.s32.totalorder %s1661_s27, %s1657_s26 }
   0xa   : > { %p309_p1 = scmp.eq.s32.totalorder %s308_s16, 0  ;;  %p322_p2 = scmp.eq.s32.totalorder %s1775_s29, 1 }
   0xb   : > { %p327_p3 = scmp.ne.s32.totalorder %s1657_s26, %s1653_s25  ;;  %p328_p4 = scmp.eq.s32.totalorder %s1347_s30, 1 }
   0xc   : > { %s1790_s17 = scalar_select %p309_p1, %s1661_s27, %s311_s15  }
   0xd   : > { %p1792_p5 = por %p322_p2, %p321_p0  ;;  %p1796_p6 = por %p328_p4, %p327_p3 }
   0xe   : > { %p1350_p7 = scmp.ge.s32.totalorder %s1665_s28, 1  ;;  %p389_p8 = scmp.lt.s32.totalorder %s1665_s28, 3 }
  0x10   : > { %p390_p9 = pnand %p1350_p7, %p389_p8 }
  0x11   : > { %p432_p10 = scmp.lt.s32.totalorder (!%p390_p9), %s1775_s29, 1  ;;  %s2041_s0 = sld [smem:[#allocation5_spill]] (!%p390_p9) }
  0x12   : > { %393 = sbr.rel (%p390_p9) target bundleno = 2454 (0x996), region = 72  ;;  %s2042_s1 = sld [smem:[#allocation6_spill]] (!%p390_p9) }
  0x13   : > { %s2043_s2 = sld [smem:[#allocation7_spill]] (!%p390_p9)  ;;  %s1669_s16 = smov (!%p390_p9), 120  }
  0x14   : > { %s1672_s22 = smov (!%p390_p9), 80   ;;  %s1673_s23 = smov (!%p390_p9), 112  }
  0x15   : > { %s1675_s30 = smov (!%p390_p9), 104   ;;  %s1676_s15 = smov (!%p390_p9), 64  }
  0x17   : > { %s433_s20 = scalar_select %p432_p10, %s1775_s29, 1  ;;  %vm440_vm0 = vcmask 261120   ;;  %v1571_v7 = vld [vmem:[%s2025_s3 + $0x8] sm:$0xff]   ;;  %v1667_v8 = vmov 0.0   ;;  %vm1668_vm1 = vmmov 0   ;;  %v1572_v9 = vld [vmem:[%s2025_s3] sm:$0xff]  }
  0x18   : > { %1424 = vmatprep.subr.bf16.mxu0 %v1667_v8  ;;  %1428 = vmatprep.mubr.msk.bf16.mxu0 %vm1668_vm1, %v1667_v8  ;;  %v1353_v14 = vld [vmem:[%s2042_s1] ss:$0 sm:$0xff]  ;;  %vm540_vm2 = vcmask 64512   ;;  %vm604_vm3 = vcmask 1043456   ;;  %vm991_vm4 = vcmask 130048   ;;  %vm993_vm5 = vcmask 195584  }
  0x19   : > { %s1352_s21 = sshll.u32 %s433_s20, 3  ;;  %1425 = vmatpush3.bf16.msra.mxu0 %v1571_v7  ;;  %1444 = vmatprep.subr.bf16.mxu1 %v1667_v8  ;;  %v1354_v16 = vld [vmem:[%s2043_s2] ss:$0 sm:$0xff]  ;;  %s1670_s20 = smov 96  }
  0x1a   : > { %s435_s24 = scalar_lea.vmem %s2041_s0, %s1352_s21  ;;  %1426 = vmatprep.subr.bf16.mxu0 %v1667_v8  ;;  %1446 = vmatprep.mubr.msk.bf16.mxu1 %vm1668_vm1, %v1667_v8  ;;  %v1355_v20 = vld [vmem:[%s2026_s4] ss:$0 sm:$0xff]  ;;  %s1671_s21 = smov 88  }
  0x1b   : > { %v1807_v0 = vld [vmem:[%s435_s24] sm:$0xff]  ;;  %s1674_s24 = smov 72  }
  0x1c   : > { %v441_v1 = vsel %vm440_vm0, %v1807_v0, 0.0 }
  0x1d   : > { %442 = vadd.xlane.f32.xlu0 %v441_v1  ;;  %1427 = vmatpush3.bf16.msra.mxu0 %v1572_v9 }
  0x1e   : > { %1432 = vmatprep.subr.bf16.mxu0 %v1667_v8 }
  0xa6   : > { %v443_v2 = vpop.xlane.xlu0 %442 }
  0xa7   : > { %v445_v3 = vmul.f32 0.03125, %v443_v2 }
  0xa9   : > { %v446_v4 = vsub.f32 %v1807_v0, %v445_v3 }
  0xab   : > { %v447_v5 = vmul.f32 %v446_v4, %v446_v4 }
  0xad   : > { %v448_v6 = vsel %vm440_vm0, %v447_v5, 0.0 }
  0xae   : > { %449 = vadd.xlane.f32.xlu0 %v448_v6 }
 0x137   : > { %v450_v10 = vpop.xlane.xlu0 %449 }
 0x138   : > { %v451_v11 = vmul.f32 0.03125, %v450_v10 }
 0x13a   : > { %v452_v12 = vadd.f32 1e-05, %v451_v11 }
 0x13c   : > { %1585 = vrsqrt.f32 %v452_v12 }
 0x149   : > { %v1586_v13 = vpop.eup %1585 }
 0x14a   : > { %v454_v15 = vmul.f32 %v1586_v13, %v446_v4 }
 0x14c   : > { %v461_v17 = vmul.f32 %v1353_v14, %v454_v15 }
 0x14e   : > { %v468_v18 = vadd.f32 %v1354_v16, %v461_v17 }
 0x150   : > { %v469_v19 = vpack.c.bf16 %v468_v18, %v468_v18 }
 0x152   : > { %1429 = vmatmul.mubr.msk.bf16.vlgmr.msra.gmra.mxu0 %vm440_vm0, %v469_v19 }
 0x153   : > { %1434 = vmatprep.mubr.msk.bf16.mxu0 %vm1668_vm1, %v1667_v8 }
 0x212   : > { %v530_v21 = vpop.f32.mrf.mxu0 }
 0x213   : > { %v531_v22 = vadd.f32 %v1355_v20, %v530_v21 }
 0x214   : > { %v1430_v23 = vpop.f32.mrf.mxu0 }
 0x215   : > { %v1839_v24 = vpack.c.bf16 %v531_v22, %v531_v22 }
 0x216   : > { %v533_v25 = vpop.f32.mrf.mxu0 }
 0x217   : > { %648 = vrot.lane.b32.xlu0 %v1839_v24, %s1669_s16  ;;  %538 = vrot.lane.b32.xlu1 %v1839_v24, %s1670_s20  ;;  %s1677_s16 = smov 56   ;;  %s1678_s20 = smov 48  }
 0x218   : > { %v1431_v26 = vpop.f32.mrf.mxu0 }
 0x21b   : > { %650 = vrot.lane.b32.xlu1 %v1839_v24, %s1671_s21  ;;  %s1679_s21 = smov 40  }
 0x21f   : > { %760 = vrot.lane.b32.xlu1 %v1839_v24, %s1672_s22  ;;  %s1680_s22 = smov 8  }
 0x223   : > { %758 = vrot.lane.b32.xlu1 %v1839_v24, %s1673_s23 }
 0x227   : > { %870 = vrot.lane.b32.xlu1 %v1839_v24, %s1674_s24 }
 0x22b   : > { %868 = vrot.lane.b32.xlu1 %v1839_v24, %s1675_s30  ;;  %s429_s30 = sand.u32 1, %s1657_s26  }
 0x289   : > { %v539_v27 = vpop.permute.xlu1 %538  ;;  %v649_v32 = vpop.permute.xlu0 %648 }
 0x28a   : > { %v545_v28 = vsel %vm540_vm2, %v539_v27, 0 }
 0x28b   : > { %1433 = vmatpush3.bf16.xpose.msra.mxu0 %v545_v28 }
 0x28c   : > { %1438 = vmatprep.subr.bf16.mxu0 %v1667_v8 }
 0x28d   : > { %v651_v29 = vpop.permute.xlu1 %650 }
 0x28e   : > { %v656_v30 = vsel %vm540_vm2, %v651_v29, 0 }
 0x28f   : > { %1445 = vmatpush3.bf16.xpose.msra.mxu1 %v656_v30 }
 0x290   : > { %1456 = vmatprep.subr.bf16.mxu1 %v1667_v8 }
 0x291   : > { %v761_v31 = vpop.permute.xlu1 %760 }
 0x292   : > { %1435 = vmatmul.mubr.msk.bf16.vlgmr.msra.gmra.mxu0 %vm540_vm2, %v1839_v24  ;;  %v766_v34 = vsel %vm540_vm2, %v761_v31, 0 }
 0x293   : > { %1440 = vmatprep.mubr.msk.bf16.mxu0 %vm1668_vm1, %v1667_v8 }
 0x295   : > { %v759_v33 = vpop.permute.xlu1 %758 }
 0x296   : > { %1447 = vmatmul.mubr.msk.bf16.vlgmr.msra.gmra.mxu1 %vm540_vm2, %v649_v32 }
 0x297   : > { %1457 = vmatpush3.bf16.xpose.msra.mxu1 %v766_v34  ;;  %1458 = vmatprep.mubr.msk.bf16.mxu1 %vm1668_vm1, %v1667_v8 }
 0x298   : > { %1468 = vmatprep.subr.bf16.mxu1 %v1667_v8 }
 0x299   : > { %v871_v35 = vpop.permute.xlu1 %870 }
 0x29a   : > { %v876_v36 = vsel %vm540_vm2, %v871_v35, 0 }
 0x29d   : > { %v869_v37 = vpop.permute.xlu1 %868 }
 0x29e   : > { %1459 = vmatmul.mubr.msk.bf16.vlgmr.msra.gmra.mxu1 %vm540_vm2, %v759_v33 }
 0x29f   : > { %1469 = vmatpush3.bf16.xpose.msra.mxu1 %v876_v36  ;;  %1470 = vmatprep.mubr.msk.bf16.mxu1 %vm1668_vm1, %v1667_v8 }
 0x2a0   : > { %1480 = vmatprep.subr.bf16.mxu1 %v1667_v8 }
 0x2a6   : > { %1471 = vmatmul.mubr.msk.bf16.vlgmr.msra.gmra.mxu1 %vm540_vm2, %v869_v37 }
 0x2a7   : > { %1484 = vmatprep.mubr.msk.bf16.mxu1 %vm1668_vm1, %v1667_v8 }
 0x352   : > { %v581_v38 = vpop.f32.mrf.mxu0 }
 0x353   : > { %v587_v39 = vsel %vm540_vm2, %v581_v38, -inf }
 0x354   : > { %588 = vmax.xlane.f32.xlu1 %v587_v39  ;;  %v1436_v40 = vpop.f32.mrf.mxu0 }
 0x356   : > { %v584_v41 = vpop.f32.mrf.mxu0  ;;  %v692_v42 = vpop.f32.mrf.mxu1 }
 0x357   : > { %v698_v43 = vsel %vm540_vm2, %v692_v42, -inf }
 0x358   : > { %699 = vmax.xlane.f32.xlu0 %v698_v43  ;;  %v1437_v44 = vpop.f32.mrf.mxu0  ;;  %v1448_v45 = vpop.f32.mrf.mxu1 }
 0x35a   : > { %v695_v46 = vpop.f32.mrf.mxu1 }
 0x35c   : > { %v1449_v47 = vpop.f32.mrf.mxu1 }
 0x35e   : > { %v802_v48 = vpop.f32.mrf.mxu1 }
 0x35f   : > { %v808_v49 = vsel %vm540_vm2, %v802_v48, -inf }
 0x360   : > { %v1460_v50 = vpop.f32.mrf.mxu1  ;;  %809 = vmax.xlane.f32.xlu1 %v808_v49  ;;  %v1574_v49 = vld [vmem:[%s2027_s5] sm:$0xff]  }
 0x362   : > { %v805_v51 = vpop.f32.mrf.mxu1 }
 0x364   : > { %v1461_v52 = vpop.f32.mrf.mxu1 }
 0x366   : > { %v912_v53 = vpop.f32.mrf.mxu1 }
 0x367   : > { %v918_v54 = vsel %vm540_vm2, %v912_v53, -inf }
 0x368   : > { %919 = vmax.xlane.f32.xlu0 %v918_v54  ;;  %v1472_v55 = vpop.f32.mrf.mxu1 }
 0x36a   : > { %v915_v56 = vpop.f32.mrf.mxu1 }
 0x36c   : > { %v1473_v57 = vpop.f32.mrf.mxu1 }
 0x3dd   : > { %v589_v58 = vpop.xlane.xlu1 %588 }
 0x3de   : > { %v590_v59 = vsub.f32 %v581_v38, %v589_v58 }
 0x3e0   : > { %v591_v60 = vmul.f32 1.442695, %v590_v59 }
 0x3e1   : > { %v700_v61 = vpop.xlane.xlu0 %699 }
 0x3e2   : > { %1587 = vpow2.f32 %v591_v60  ;;  %v701_v62 = vsub.f32 %v692_v42, %v700_v61 }
 0x3e4   : > { %v702_v63 = vmul.f32 1.442695, %v701_v62 }
 0x3e6   : > { %1589 = vpow2.f32 %v702_v63 }
 0x3e9   : > { %v810_v11 = vpop.xlane.xlu1 %809 }
 0x3ea   : > { %v811_v12 = vsub.f32 %v802_v48, %v810_v11  ;;  %v1573_v48 = vld [vmem:[%s2027_s5 + $0x8] sm:$0xff]  }
 0x3eb   : > { %1481 = vmatpush3.bf16.msra.mxu1 %v1573_v48 }
 0x3ec   : > { %v812_v13 = vmul.f32 1.442695, %v811_v12  ;;  %1482 = vmatprep.subr.bf16.mxu1 %v1667_v8 }
 0x3ef   : > { %v1588_v1 = vpop.eup %1587  ;;  %1483 = vmatpush3.bf16.msra.mxu1 %v1574_v49 }
 0x3f0   : > { %v593_v2 = vsel %vm540_vm2, %v1588_v1, 0.0  ;;  %1496 = vmatprep.subr.bf16.mxu1 %v1667_v8 }
 0x3f1   : > { %v920_v3 = vpop.xlane.xlu0 %919  ;;  %594 = vadd.xlane.f32.xlu1 %v593_v2  ;;  %v1367_v2 = vld [vmem:[%s2028_s6] ss:$0 sm:$0xff] }
 0x3f2   : > { %v921_v4 = vsub.f32 %v912_v53, %v920_v3 }
 0x3f3   : > { %v1590_v5 = vpop.eup %1589 }
 0x3f4   : > { %v922_v6 = vmul.f32 1.442695, %v921_v4  ;;  %v704_v7 = vsel %vm540_vm2, %v1590_v5, 0.0 }
 0x3f5   : > { %705 = vadd.xlane.f32.xlu0 %v704_v7 }
 0x3f6   : > { %1591 = vpow2.f32 %v922_v6 }
 0x3f7   : > { %1593 = vpow2.f32 %v812_v13 }
 0x402   : > { %599 = vrot.lane.b32.xlu1 %v1839_v24, %s1676_s15  ;;  %s1351_s15 = sshll.u32 %s429_s30, 3 }
 0x403   : > { %v1592_v9 = vpop.eup %1591 }
 0x404   : > { %v924_v10 = vsel %vm540_vm2, %v1592_v9, 0.0  ;;  %v1594_v14 = vpop.eup %1593 }
 0x405   : > { %925 = vadd.xlane.f32.xlu0 %v924_v10  ;;  %v814_v15 = vsel %vm540_vm2, %v1594_v14, 0.0 }
 0x41b   : > { %710 = vrot.lane.b32.xlu0 %v1839_v24, %s1677_s16  ;;  %s1681_s16 = smov 16  }
 0x426   : > { %815 = vadd.xlane.f32.xlu1 %v814_v15 }
 0x437   : > { %820 = vrot.lane.b32.xlu1 %v1839_v24, %s1678_s20  ;;  %s1682_s20 = smov 24  }
 0x43b   : > { %930 = vrot.lane.b32.xlu1 %v1839_v24, %s1679_s21  ;;  %s1387_s21 = sshll.u32 %s1775_s29, 7  ;;  %s1275_s29 = scalar_lea.sflag [#allocation3], %s429_s30 }
 0x43c   : > { %s1980_s1 = scalar_lea.hbm %s2035_s13, %s1387_s21 }
 0x47a   : > { %v595_v16 = vpop.xlane.xlu1 %594 }
 0x47b   : > { %1595 = vrcp.f32 %v595_v16  ;;  %v1575_v16 = vld [vmem:[%s2031_s9 + $0x8] sm:$0xff]  }
 0x47e   : > { %v706_v17 = vpop.xlane.xlu0 %705  ;;  %v600_v18 = vpop.permute.xlu1 %599 }
 0x47f   : > { %v606_v19 = vsel %vm604_vm3, %v600_v18, 0  ;;  %1597 = vrcp.f32 %v706_v17  ;;  %v1577_v17 = vld [vmem:[%s2033_s11 + $0x38] sm:$0xff]   ;;  %v1578_v18 = vld [vmem:[%s2033_s11 + $0x30] sm:$0xff]  }
 0x480   : > { %1439 = vmatpush3.bf16.msra.mxu0 %v606_v19  ;;  %v1579_v19 = vld [vmem:[%s2033_s11 + $0x28] sm:$0xff]  }
 0x481   : > { %1450 = vmatprep.subr.bf16.mxu0 %v1667_v8 }
 0x488   : > { %v1596_v20 = vpop.eup %1595 }
 0x489   : > { %v597_v21 = vmul.f32 %v1596_v20, %v1588_v1  ;;  %v1580_v20 = vld [vmem:[%s2033_s11 + $0x20] sm:$0xff]  }
 0x48b   : > { %v598_v22 = vpack.c.bf16 %v597_v21, %v597_v21  ;;  %v1581_v21 = vld [vmem:[%s2033_s11 + $0x18] sm:$0xff]  }
 0x48c   : > { %v1598_v23 = vpop.eup %1597 }
 0x48d   : > { %1441 = vmatmul.mubr.msk.bf16.vlgmr.msra.gmra.mxu0 %vm540_vm2, %v598_v22  ;;  %v708_v24 = vmul.f32 %v1598_v23, %v1590_v5  ;;  %v1582_v22 = vld [vmem:[%s2033_s11 + $0x10] sm:$0xff]  }
 0x48e   : > { %v926_v25 = vpop.xlane.xlu0 %925  ;;  %1452 = vmatprep.mubr.msk.bf16.mxu0 %vm1668_vm1, %v1667_v8 }
 0x48f   : > { %v709_v28 = vpack.c.bf16 %v708_v24, %v708_v24 }
 0x492   : > { %v711_v26 = vpop.permute.xlu0 %710 }
 0x493   : > { %v716_v27 = vsel %vm604_vm3, %v711_v26, 0 }
 0x494   : > { %1451 = vmatpush3.bf16.msra.mxu0 %v716_v27  ;;  %v1371_v27 = vld [vmem:[%s2029_s7] ss:$0 sm:$0xff] }
 0x495   : > { %1462 = vmatprep.subr.bf16.mxu0 %v1667_v8 }
 0x497   : > { %1453 = vmatmul.mubr.msk.bf16.vlgmr.msra.gmra.mxu0 %vm540_vm2, %v709_v28 }
 0x498   : > { %1464 = vmatprep.mubr.msk.bf16.mxu0 %vm1668_vm1, %v1667_v8 }
 0x4af   : > { %v816_v29 = vpop.xlane.xlu1 %815 }
 0x4b0   : > { %1599 = vrcp.f32 %v816_v29  ;;  %v1372_v29 = vld [vmem:[%s2030_s8] ss:$0 sm:$0xff] }
 0x4b1   : > { %1601 = vrcp.f32 %v926_v25 }
 0x4b3   : > { %v821_v30 = vpop.permute.xlu1 %820 }
 0x4b4   : > { %v826_v31 = vsel %vm604_vm3, %v821_v30, 0 }
 0x4b5   : > { %1463 = vmatpush3.bf16.msra.mxu0 %v826_v31 }
 0x4b6   : > { %1474 = vmatprep.subr.bf16.mxu0 %v1667_v8 }
 0x4b7   : > { %v931_v34 = vpop.permute.xlu1 %930 }
 0x4b8   : > { %v936_v37 = vsel %vm604_vm3, %v931_v34, 0  ;;  %v1584_v34 = vld [vmem:[%s2033_s11] sm:$0xff]  }
 0x4bd   : > { %v1600_v32 = vpop.eup %1599 }
 0x4be   : > { %v818_v33 = vmul.f32 %v1600_v32, %v1594_v14  ;;  %v1602_v36 = vpop.eup %1601 }
 0x4bf   : > { %v928_v38 = vmul.f32 %v1602_v36, %v1592_v9 }
 0x4c0   : > { %v819_v35 = vpack.c.bf16 %v818_v33, %v818_v33  ;;  %v1583_v33 = vld [vmem:[%s2033_s11 + $0x8] sm:$0xff]  }
 0x4c1   : > { %v929_v39 = vpack.c.bf16 %v928_v38, %v928_v38 }
 0x4c2   : > { %1465 = vmatmul.mubr.msk.bf16.vlgmr.msra.gmra.mxu0 %vm540_vm2, %v819_v35  ;;  %v1373_v35 = vld [vmem:[%s2032_s10] ss:$0 sm:$0xff] }
 0x4c3   : > { %1475 = vmatpush3.bf16.msra.mxu0 %v936_v37  ;;  %1476 = vmatprep.mubr.msk.bf16.mxu0 %vm1668_vm1, %v1667_v8 }
 0x4c4   : > { %1488 = vmatprep.subr.bf16.mxu0 %v1667_v8 }
 0x4ca   : > { %1477 = vmatmul.mubr.msk.bf16.vlgmr.msra.gmra.mxu0 %vm540_vm2, %v929_v39 }
 0x4cb   : > { %1492 = vmatprep.mubr.msk.bf16.mxu0 %vm1668_vm1, %v1667_v8  ;;  %1489 = vmatpush3.bf16.msra.mxu0 %v1575_v16 }
 0x4cc   : > { %1490 = vmatprep.subr.bf16.mxu0 %v1667_v8 }
 0x54d   : > { %v642_v40 = vpop.f32.mrf.mxu0 }
 0x54f   : > { %v1442_v41 = vpop.f32.mrf.mxu0 }
 0x551   : > { %v645_v42 = vpop.f32.mrf.mxu0 }
 0x553   : > { %v1443_v43 = vpop.f32.mrf.mxu0 }
 0x557   : > { %v752_v44 = vpop.f32.mrf.mxu0 }
 0x558   : > { %979 = vrot.lane.b32.xlu0 %v752_v44, %s1680_s22  ;;  %s431_s22 = scalar_lea.vmem [#allocation2], %s1351_s15 }
 0x559   : > { %v1454_v45 = vpop.f32.mrf.mxu0  ;;  %s1288_s23 = sshll.u32 %s431_s22, 4  ;;  %s1982_s23 = int_to_ptr.vmem [resolvable:$true] %s1288_s23 }
 0x55a   : > { %s1605_s15 = scalar_lea.vmem %s1982_s23, 128 }
 0x55b   : > { %v755_v46 = vpop.f32.mrf.mxu0  ;;  %p1606_p11 = scmp.ne.s32.totalorder %s1982_s23, %s1605_s15 }
 0x55d   : > { %v1455_v47 = vpop.f32.mrf.mxu0  ;;  %p1607_p12 = pnand %p1606_p11, %p1792_p5 }
 0x55f   : > { %p1608_p13 = pneg %p1607_p12 }
 0x582   : > { %v862_v50 = vpop.f32.mrf.mxu0 }
 0x583   : > { %983 = vrot.lane.b32.xlu1 %v862_v50, %s1681_s16  ;;  %s1683_s16 = smov [#allocation2]  }
 0x584   : > { %v1466_v51 = vpop.f32.mrf.mxu0 }
 0x586   : > { %v865_v52 = vpop.f32.mrf.mxu0 }
 0x588   : > { %v1467_v53 = vpop.f32.mrf.mxu0 }
 0x58a   : > { %v972_v54 = vpop.f32.mrf.mxu0 }
 0x58b   : > { %987 = vrot.lane.b32.xlu0 %v972_v54, %s1682_s20  ;;  %s1609_s20 = sshll.u32 %s1683_s16, 4  ;;  %s1610_s20 = int_to_ptr.vmem [resolvable:$false] %s1609_s20 }
 0x58c   : > { %v1478_v55 = vpop.f32.mrf.mxu0  ;;  %s1611_s0 = scalar_lea.vmem %s1610_s20, 256  ;;  %p1612_p0 = scmp.lt.s32.totalorder %s1982_s23, %s1610_s20 }
 0x58d   : > { %p1613_p1 = scmp.lt.s32.totalorder %s1611_s0, %s1605_s15 }
 0x58e   : > { %v975_v56 = vpop.f32.mrf.mxu0 }
 0x58f   : > { %p1614_p2 = por %p1613_p1, %p1612_p0 }
 0x590   : > { %v1479_v57 = vpop.f32.mrf.mxu0 }
 0x591   : > { %p1615_p3 = pnand %p1614_p2, %p1608_p13 }
 0x5ca   : > { %v980_v58 = vpop.permute.xlu0 %979 }
 0x5cb   : > { %v990_v60 = vsel %vm540_vm2, %v642_v40, %v980_v58 }
 0x5f5   : > { %v984_v59 = vpop.permute.xlu1 %983 }
 0x5f6   : > { %v992_v61 = vsel %vm991_vm4, %v990_v60, %v984_v59 }
 0x5fd   : > { %v988_v62 = vpop.permute.xlu0 %987 }
 0x5fe   : > { %v994_v63 = vsel %vm993_vm5, %v992_v61, %v988_v62 }
 0x5ff   : > { %v995_v1 = vpack.c.bf16 %v994_v63, %v994_v63 }
 0x601   : > { %1485 = vmatmul.mubr.msk.bf16.vlgmr.msra.gmra.mxu1 %vm440_vm0, %v995_v1 }
 0x602   : > { %1512 = vmatprep.mubr.msk.bf16.mxu1 %vm1668_vm1, %v1667_v8  ;;  %1497 = vmatpush3.bf16.msra.mxu1 %v1577_v17 }
 0x603   : > { %1498 = vmatprep.subr.bf16.mxu1 %v1667_v8 }
 0x606   : > { %1499 = vmatpush3.bf16.msra.mxu1 %v1578_v18 }
 0x607   : > { %1500 = vmatprep.subr.bf16.mxu1 %v1667_v8 }
 0x60a   : > { %1501 = vmatpush3.bf16.msra.mxu1 %v1579_v19 }
 0x60b   : > { %1502 = vmatprep.subr.bf16.mxu1 %v1667_v8 }
 0x60e   : > { %1503 = vmatpush3.bf16.msra.mxu1 %v1580_v20 }
 0x60f   : > { %1504 = vmatprep.subr.bf16.mxu1 %v1667_v8 }
 0x612   : > { %1505 = vmatpush3.bf16.msra.mxu1 %v1581_v21 }
 0x613   : > { %1506 = vmatprep.subr.bf16.mxu1 %v1667_v8 }
 0x616   : > { %1507 = vmatpush3.bf16.msra.mxu1 %v1582_v22 }
 0x617   : > { %1508 = vmatprep.subr.bf16.mxu1 %v1667_v8 }
 0x61a   : > { %1509 = vmatpush3.bf16.msra.mxu1 %v1583_v33 }
 0x61b   : > { %1510 = vmatprep.subr.bf16.mxu1 %v1667_v8  ;;  %v1377_v8 = vld [vmem:[%s2034_s12] ss:$0 sm:$0xff] }
 0x61e   : > { %1511 = vmatpush3.bf16.msra.mxu1 %v1584_v34 }
 0x6c1   : > { %v1056_v3 = vpop.f32.mrf.mxu1 }
 0x6c2   : > { %v1057_v4 = vadd.f32 %v1367_v2, %v1056_v3 }
 0x6c3   : > { %v1486_v5 = vpop.f32.mrf.mxu1 }
 0x6c4   : > { %v1917_v6 = vadd.f32 %v1057_v4, %v1807_v0  ;;  %v1576_v0 = vld [vmem:[%s2031_s9] sm:$0xff]  }
 0x6c5   : > { %v1059_v7 = vpop.f32.mrf.mxu1  ;;  %1491 = vmatpush3.bf16.msra.mxu0 %v1576_v0 }
 0x6c6   : > { %v1065_v9 = vsel %vm440_vm0, %v1917_v6, 0.0 }
 0x6c7   : > { %1066 = vadd.xlane.f32.xlu1 %v1065_v9  ;;  %v1487_v10 = vpop.f32.mrf.mxu1 }
 0x750   : > { %v1067_v11 = vpop.xlane.xlu1 %1066 }
 0x751   : > { %v1068_v12 = vmul.f32 0.03125, %v1067_v11 }
 0x753   : > { %v1069_v13 = vsub.f32 %v1917_v6, %v1068_v12 }
 0x755   : > { %v1070_v14 = vmul.f32 %v1069_v13, %v1069_v13 }
 0x757   : > { %v1071_v15 = vsel %vm440_vm0, %v1070_v14, 0.0 }
 0x758   : > { %1072 = vadd.xlane.f32.xlu0 %v1071_v15 }
 0x7e1   : > { %v1073_v23 = vpop.xlane.xlu0 %1072 }
 0x7e2   : > { %v1074_v25 = vmul.f32 0.03125, %v1073_v23 }
 0x7e4   : > { %v1075_v24 = vadd.f32 1e-05, %v1074_v25 }
 0x7e6   : > { %1603 = vrsqrt.f32 %v1075_v24 }
 0x7f3   : > { %v1604_v26 = vpop.eup %1603 }
 0x7f4   : > { %v1077_v28 = vmul.f32 %v1604_v26, %v1069_v13 }
 0x7f6   : > { %v1084_v30 = vmul.f32 %v1371_v27, %v1077_v28 }
 0x7f8   : > { %v1091_v31 = vadd.f32 %v1372_v29, %v1084_v30 }
 0x7fa   : > { %v1092_v32 = vpack.c.bf16 %v1091_v31, %v1091_v31 }
 0x7fc   : > { %1493 = vmatmul.mubr.msk.bf16.vlgmr.msra.gmra.mxu0 %vm440_vm0, %v1092_v32 }
 0x8bc   : > { %v1153_v36 = vpop.f32.mrf.mxu0 }
 0x8bd   : > { %v1154_v37 = vadd.f32 %v1373_v35, %v1153_v36 }
 0x8be   : > { %v1494_v38 = vpop.f32.mrf.mxu0 }
 0x8bf   : > { %v1159_v39 = vmax.f32 %v1154_v37, 0.0 }
 0x8c0   : > { %v1156_v40 = vpop.f32.mrf.mxu0 }
 0x8c1   : > { %v1160_v41 = vpack.c.bf16 %v1159_v39, %v1159_v39 }
 0x8c2   : > { %v1495_v42 = vpop.f32.mrf.mxu0 }
 0x8c3   : > { %1513 = vmatmul.mubr.bf16.vlgmr.msra.gmra.mxu1 %v1160_v41 }
 0x983   : > { %v1266_v43 = vpop.f32.mrf.mxu1 }
 0x984   : > { %v1267_v44 = vadd.f32 %v1377_v8, %v1266_v43 }
 0x985   : > { %v1514_v45 = vpop.f32.mrf.mxu1 }
 0x986   : > { %v1272_v46 = vadd.f32 %v1267_v44, %v1917_v6 }
 0x987   : > { %v1269_v47 = vpop.f32.mrf.mxu1 }
 0x988   : > { %1273 = vst.msk [vmem:[%s431_s22] sm:$0xff] %vm440_vm0, %v1272_v46 }
 0x989   : > { %v1515_v48 = vpop.f32.mrf.mxu1 }
 0x98a   : > { %1618 = shalt.err (!%p1615_p3)
}
 0x98b   : > { %s1619_s21 = scalar_lea.hbm %s1980_s1, 128  ;;  %s1623_s24 = scalar_lea.hbm %s2035_s13, 256 }
 0x98c   : > { %p1620_p4 = scmp.ne.s32.totalorder %s1980_s1, %s1619_s21  ;;  %p1624_p9 = scmp.lt.s32.totalorder %s1980_s1, %s2035_s13 }
 0x98d   : > { %p1625_p10 = scmp.lt.s32.totalorder %s1623_s24, %s1619_s21 }
 0x98e   : > { %p1621_p7 = pnand %p1620_p4, %p1792_p5 }
 0x98f   : > { %p1626_p11 = por %p1625_p10, %p1624_p9 }
 0x990   : > { %p1622_p8 = pneg %p1621_p7 }
 0x992   : > { %p1627_p12 = pnand %p1626_p11, %p1622_p8 }
 0x994   : > { %1630 = shalt.err (!%p1627_p12)
}
 0x995   : > { %1516 = dma.vmem_to_hbm [thread:$0]  (%p1792_p5), %s1982_s23, 128, %s1980_s1, %s1275_s29  }
 0x996 PF: > { %p1522_p13 = scmp.ge.s32.totalorder %s1665_s28, 2  ;;  %s1300_s15 = sand.u32 1, %s1653_s25  }
 0x997   : > { %s1301_s2 = scalar_lea.sflag [#allocation3], %s1300_s15 }
 0x998   : > { %p1519_p0 = pnand %p1522_p13, %p1796_p6 }
 0x99a   : > { %p1520_p1 = pneg %p1519_p0 }
 0x99c   : > { %1648 = dma.done.wait (%p1520_p1), %s1301_s2, 128  }
 0x99d   : > { %1650 = vsyncadd (%p1520_p1), %s1301_s2, 4294967168  ;;  %p23_p2 = scmp.ge.s32.totalorder %s1779_s14, 4   ;;  %s2044_s25 = smov %s1657_s26 }
 0x99e   : > { %s2045_s26 = smov %s1661_s27  ;;  %s2046_s27 = smov %s1790_s17 }
 0x99f   : > { %s2047_s28 = smov %s1779_s14  ;;  %25 = sbr.rel (!%p23_p2) target bundleno = 7 (0x7), region = 107 }
 0x9a4   :  { %1306 = vsyncpa [#allocation3], 1 }
 0x9a5   :  { %1308 = vsyncpa [#allocation3 + $0x1], 1 }

</bundles_post_ra>
